<compile_context>
chip_gen: v5e
topology: v5e:2x2
jax: 0.10.0
libtpu: 0.0.40
codegen_flags: <defaults>
</compile_context>

<pallas_src>
import functools
import math

import jax
import jax.numpy as jnp
from jax.experimental import pallas as pl
from jax.experimental.pallas import tpu as pltpu


def _round_up(x, m):
    return (x + m - 1) // m * m


def _pick_tile(dim, target, align, allow_pad=True):
    """Return (tile, padded_dim): tile is a multiple of `align`, <= target and
    divides padded_dim.  If the divisor structure of round_up(dim, align) is
    degenerate (best divisor << target) and allow_pad, pad the dimension up to
    a multiple of `target` instead of shrinking the tile."""
    dim_p = _round_up(dim, align)
    if dim_p <= target:
        return dim_p, dim_p
    best = align
    for t in range(align, target + 1, align):
        if dim_p % t == 0:
            best = t
    if allow_pad and best * 4 < target:
        return target, _round_up(dim, target)
    return best, dim_p


_VMEM_LIMIT = None


def _vmem_limit_bytes():
    # v7x has only 64 MiB VMEM per TensorCore -> stay well below it; on
    # v5e/v6e (128 MiB physical) allow up to 96 MiB of scoped VMEM.
    limit = 48 * 1024 * 1024
    try:
        cap = pltpu.get_tpu_info().vmem_capacity_bytes
        limit = max(limit, min(cap - 16 * 1024 * 1024, 96 * 1024 * 1024))
    except Exception:
        pass
    return limit


def _compiler_params(sem):
    global _VMEM_LIMIT
    if _VMEM_LIMIT is None:
        _VMEM_LIMIT = _vmem_limit_bytes()
    return pltpu.CompilerParams(dimension_semantics=sem,
                                vmem_limit_bytes=_VMEM_LIMIT)


# ---------------------- dense: matmul + bias (+ GELU) -----------------------

def _dense_kernel(x_ref, w_ref, b_ref, o_ref, acc_ref, *, activation):
    @pl.when(pl.program_id(2) == 0)
    def _init():
        acc_ref[...] = jnp.zeros_like(acc_ref)

    acc_ref[...] += jnp.dot(x_ref[...], w_ref[...],
                            preferred_element_type=jnp.float32)

    @pl.when(pl.program_id(2) == pl.num_programs(2) - 1)
    def _finalize():
        y = acc_ref[...] + b_ref[...]
        if activation == "gelu":
            # TODO(synk): HF RoFormer hidden_act="gelu" is exact erf-GELU;
            # tanh approximation used here for a Mosaic-safe lowering.
            c = 0.7978845608028654  # sqrt(2/pi)
            y = 0.5 * y * (1.0 + jnp.tanh(c * (y + 0.044715 * y * y * y)))
        o_ref[...] = y.astype(o_ref.dtype)


def dense(x, w, b, activation=None, out_dtype=jnp.bfloat16):
    """x: (M, Kx).  w: (Kp, Np) pre-padded to 128-multiples.  b: (1, Np)."""
    M, Kx = x.shape
    Kp, Np = w.shape
    x = x.astype(jnp.bfloat16)

    tm, Mp = _pick_tile(M, 512, 16)
    if Mp // tm == 1 and tm % 32 == 0:
        tm //= 2                      # keep >=2 parallel M-tiles (v7x, 2 TCs)
    tn, _ = _pick_tile(Np, 512, 128, allow_pad=False)
    tk, _ = _pick_tile(Kp, 512, 128, allow_pad=False)

    if Kx != Kp or Mp != M:
        x = jnp.pad(x, ((0, Mp - M), (0, Kp - Kx)))

    grid = (Mp // tm, Np // tn, Kp // tk)
    cost = pl.CostEstimate(
        flops=2 * Mp * Np * Kp,
        transcendentals=Mp * Np if activation == "gelu" else 0,
        bytes_accessed=2 * (Mp * Kp + Kp * Np + Mp * Np) + 4 * Np,
    )
    out = pl.pallas_call(
        functools.partial(_dense_kernel, activation=activation),
        out_shape=jax.ShapeDtypeStruct((Mp, Np), out_dtype),
        grid_spec=pltpu.PrefetchScalarGridSpec(
            num_scalar_prefetch=0,
            grid=grid,
            in_specs=[
                pl.BlockSpec((tm, tk), lambda i, j, k: (i, k)),
                pl.BlockSpec((tk, tn), lambda i, j, k: (k, j)),
                pl.BlockSpec((1, tn), lambda i, j, k: (0, j)),
            ],
            out_specs=pl.BlockSpec((tm, tn), lambda i, j, k: (i, j)),
            scratch_shapes=[pltpu.VMEM((tm, tn), jnp.float32)],
        ),
        compiler_params=_compiler_params(("parallel", "parallel", "arbitrary")),
        cost_estimate=cost,
    )(x, w, b)
    return out[:M] if Mp != M else out


# ------------- dense + residual-add + LayerNorm fused in the K-epilogue -----

def _dense_add_ln_kernel(x_ref, w_ref, b_ref, r_ref, g_ref, bb_ref,
                         o_ref, acc_ref, *, n_true, eps):
    @pl.when(pl.program_id(1) == 0)
    def _init():
        acc_ref[...] = jnp.zeros_like(acc_ref)

    acc_ref[...] += jnp.dot(x_ref[...], w_ref[...],
                            preferred_element_type=jnp.float32)

    @pl.when(pl.program_id(1) == pl.num_programs(1) - 1)
    def _finalize():
        h = acc_ref[...] + b_ref[...] + r_ref[...].astype(jnp.float32)
        n_pad = h.shape[-1]
        if n_pad == n_true:
            mu = jnp.mean(h, axis=-1, keepdims=True)
            var = jnp.mean(jnp.square(h - mu), axis=-1, keepdims=True)
        else:
            # Padded columns of h are exactly zero by construction (zero-padded
            # weights / biases / residual), so moments over the true width are
            # plain sums divided by n_true.
            inv_n = 1.0 / n_true
            mu = jnp.sum(h, axis=-1, keepdims=True) * inv_n
            var = jnp.sum(h * h, axis=-1, keepdims=True) * inv_n - mu * mu
        y = (h - mu) * jax.lax.rsqrt(var + eps)
        # gamma/beta are zero in padded columns -> padded output stays zero.
        o_ref[...] = (y * g_ref[...] + bb_ref[...]).astype(o_ref.dtype)


def dense_add_ln(x, w, b, residual, gamma, beta, *, n_true, eps=1e-12,
                 out_dtype=jnp.bfloat16):
    """LayerNorm((x @ w + b) + residual).  w pre-padded to (Kp, Np); the full
    (padded) N lives in one output tile so the LN epilogue sees whole rows."""
    M, Kx = x.shape
    Kp, Np = w.shape
    x = x.astype(jnp.bfloat16)

    tm, Mp = _pick_tile(M, 512, 16)
    if Mp // tm == 1 and tm % 32 == 0:
        tm //= 2
    tk, _ = _pick_tile(Kp, 512, 128, allow_pad=False)

    if Kx != Kp or Mp != M:
        x = jnp.pad(x, ((0, Mp - M), (0, Kp - Kx)))

    bcast_res = residual.shape[0] == 1
    if residual.shape[1] != Np:
        residual = jnp.pad(residual, ((0, 0), (0, Np - residual.shape[1])))
    if not bcast_res and residual.shape[0] != Mp:
        residual = jnp.pad(residual, ((0, Mp - residual.shape[0]), (0, 0)))
    r_block = (1, Np) if bcast_res else (tm, Np)
    r_map = (lambda i, k: (0, 0)) if bcast_res else (lambda i, k: (i, 0))

    grid = (Mp // tm, Kp // tk)
    cost = pl.CostEstimate(
        flops=2 * Mp * Np * Kp + 10 * Mp * Np,
        transcendentals=Mp,
        bytes_accessed=2 * (Mp * Kp + Kp * Np + 2 * Mp * Np) + 12 * Np,
    )
    out = pl.pallas_call(
        functools.partial(_dense_add_ln_kernel, n_true=n_true, eps=eps),
        out_shape=jax.ShapeDtypeStruct((Mp, Np), out_dtype),
        grid_spec=pltpu.PrefetchScalarGridSpec(
            num_scalar_prefetch=0,
            grid=grid,
            in_specs=[
                pl.BlockSpec((tm, tk), lambda i, k: (i, k)),
                pl.BlockSpec((tk, Np), lambda i, k: (k, 0)),
                pl.BlockSpec((1, Np), lambda i, k: (0, 0)),
                pl.BlockSpec(r_block, r_map),
                pl.BlockSpec((1, Np), lambda i, k: (0, 0)),
                pl.BlockSpec((1, Np), lambda i, k: (0, 0)),
            ],
            out_specs=pl.BlockSpec((tm, Np), lambda i, k: (i, 0)),
            scratch_shapes=[pltpu.VMEM((tm, Np), jnp.float32)],
        ),
        compiler_params=_compiler_params(("parallel", "arbitrary")),
        cost_estimate=cost,
    )(x, w, b, residual, gamma, beta)
    return out[:M] if Mp != M else out


# ---------------------- flash attention (head-batched) ----------------------

def _flash_attn_kernel(valid_ref, q_ref, k_ref, v_ref, o_ref,
                       m_sc, l_sc, acc_sc):
    b = pl.program_id(0)
    ki = pl.program_id(2)
    tkv = k_ref.shape[2]
    valid = valid_ref[b]

    @pl.when(ki == 0)
    def _init():
        m_sc[...] = jnp.full_like(m_sc, -1e30)
        l_sc[...] = jnp.zeros_like(l_sc)
        acc_sc[...] = jnp.zeros_like(acc_sc)

    # Skip kv tiles that are entirely padding (init/finalize stay outside).
    @pl.when(ki * tkv < valid)
    def _body():
        q = q_ref[0]                                 # (H, tq, Dh) rotated+scaled
        k = k_ref[0]                                 # (H, tkv, Dh) rotated
        v = v_ref[0]                                 # (H, tkv, Dh)
        tq = q.shape[1]
        s = jnp.einsum("hqd,hkd->hqk", q, k,
                       preferred_element_type=jnp.float32)
        col = jax.lax.broadcasted_iota(jnp.int32, (1, tq, tkv), 2) + ki * tkv
        s = jnp.where(col < valid, s, -1e30)         # key-padding mask
        m_prev = m_sc[...]
        m_new = jnp.maximum(m_prev, jnp.max(s, axis=-1, keepdims=True))
        alpha = jnp.exp(m_prev - m_new)
        p = jnp.exp(s - m_new)
        l_sc[...] = alpha * l_sc[...] + jnp.sum(p, axis=-1, keepdims=True)
        m_sc[...] = m_new
        pv = jnp.einsum("hqk,hkd->hqd", p.astype(jnp.bfloat16), v,
                        preferred_element_type=jnp.float32)
        acc_sc[...] = alpha * acc_sc[...] + pv

    @pl.when(ki == pl.num_programs(2) - 1)
    def _finalize():
        o_ref[0] = (acc_sc[...] * pl.reciprocal(l_sc[...], approx=True)
                    ).astype(o_ref.dtype)


def flash_attention(q, k, v, valid, *, tile_t):
    B, H, Tp, Dh = q.shape
    nt = Tp // tile_t
    cost = pl.CostEstimate(
        flops=4 * B * H * Tp * Tp * Dh,
        transcendentals=B * H * Tp * Tp,
        bytes_accessed=2 * 4 * B * H * Tp * Dh,
    )
    return pl.pallas_call(
        _flash_attn_kernel,
        out_shape=jax.ShapeDtypeStruct((B, H, Tp, Dh), jnp.bfloat16),
        grid_spec=pltpu.PrefetchScalarGridSpec(
            num_scalar_prefetch=1,
            grid=(B, nt, nt),
            in_specs=[
                pl.BlockSpec((1, H, tile_t, Dh),
                             lambda b, qi, ki, vl: (b, 0, qi, 0)),
                pl.BlockSpec((1, H, tile_t, Dh),
                             lambda b, qi, ki, vl: (b, 0, ki, 0)),
                pl.BlockSpec((1, H, tile_t, Dh),
                             lambda b, qi, ki, vl: (b, 0, ki, 0)),
            ],
            out_specs=pl.BlockSpec((1, H, tile_t, Dh),
                                   lambda b, qi, ki, vl: (b, 0, qi, 0)),
            scratch_shapes=[
                pltpu.VMEM((H, tile_t, 1), jnp.float32),    # running max
                pltpu.VMEM((H, tile_t, 1), jnp.float32),    # running sum
                pltpu.VMEM((H, tile_t, Dh), jnp.float32),   # output accumulator
            ],
        ),
        compiler_params=_compiler_params(("parallel", "parallel", "arbitrary")),
        cost_estimate=cost,
    )(valid, q, k, v)


# ----------------------------- JAX glue -------------------------------------

def build_rope(T, Dh):
    # HF RoFormerSinusoidalPositionalEmbedding angles, arranged for the
    # rotate-half formulation (both halves carry theta_0..theta_{Dh/2-1}).
    pos = jnp.arange(T, dtype=jnp.float32)[:, None]
    inv_freq = jnp.power(10000.0, -jnp.arange(0, Dh, 2, dtype=jnp.float32) / Dh)
    ang = pos * inv_freq[None, :]                       # (T, Dh//2)
    sin = jnp.concatenate([jnp.sin(ang), jnp.sin(ang)], axis=-1)
    cos = jnp.concatenate([jnp.cos(ang), jnp.cos(ang)], axis=-1)
    return sin, cos                                     # each (T, Dh)


def _apply_rope(x, sin, cos):
    # x: (B, T, H, Dh) with per-head columns pre-permuted to even|odd order,
    # so rotate-half equals HF's interleaved rotary for the q.k^T product.
    half = x.shape[-1] // 2
    x = x.astype(jnp.float32)
    xr = jnp.concatenate([-x[..., half:], x[..., :half]], axis=-1)
    return x * cos[None, :, None, :] + xr * sin[None, :, None, :]


def init_params(key, c_in, stride, d, d_ff, n_layers):
    keys = iter(jax.random.split(key, 8 + 12 * n_layers))

    def nrm(shape):
        return jax.random.normal(next(keys), shape, jnp.float32) * 0.02

    params = {
        "conv_w": nrm((d, c_in, stride)),   # Conv1d weight (out, in, kernel)
        "conv_b": nrm((d,)),
        "tte": nrm((2, d)),                 # token_type_embeddings (row 0 used)
        "emb_ln_g": jnp.ones((d,), jnp.float32),
        "emb_ln_b": jnp.zeros((d,), jnp.float32),
        "layers": [],
    }
    for _ in range(n_layers):
        params["layers"].append({
            "wq": nrm((d, d)), "bq": nrm((d,)),
            "wk": nrm((d, d)), "bk": nrm((d,)),
            "wv": nrm((d, d)), "bv": nrm((d,)),
            "wo": nrm((d, d)), "bo": nrm((d,)),
            "ln1_g": jnp.ones((d,), jnp.float32), "ln1_b": jnp.zeros((d,), jnp.float32),
            "w1": nrm((d, d_ff)), "b1": nrm((d_ff,)),
            "w2": nrm((d_ff, d)), "b2": nrm((d,)),
            "ln2_g": jnp.ones((d,), jnp.float32), "ln2_b": jnp.zeros((d,), jnp.float32),
        })
    return params


def pack_params(params, n_heads):
    """One-time (outside jit) weight prep: fuse QKV into one weight, permute
    q/k output columns to even|odd order per head (rotate-half == interleaved
    rotary), fold 1/sqrt(Dh) into wq/bq, cast matmul weights to bf16, and
    zero-pad every weight/bias/gamma/beta to 128-multiples so dense() never
    pads weights per call."""
    D = params["conv_w"].shape[0]
    Dh = D // n_heads
    assert Dh % 2 == 0, "rotary head dim must be even"
    scale = 1.0 / math.sqrt(Dh)

    perm = []
    for h in range(n_heads):
        base = h * Dh
        perm += list(range(base, base + Dh, 2))
        perm += list(range(base + 1, base + Dh, 2))
    perm = jnp.asarray(perm, dtype=jnp.int32)

    def pad_w(w):
        K, N = w.shape
        return jnp.pad(w, ((0, _round_up(K, 128) - K),
                           (0, _round_up(N, 128) - N))).astype(jnp.bfloat16)

    def pad_v(v):
        N = v.shape[0]
        return jnp.pad(v, (0, _round_up(N, 128) - N)).reshape(1, -1).astype(jnp.float32)

    c_in, ksz = params["conv_w"].shape[1], params["conv_w"].shape[2]
    packed = {
        "conv_w": pad_w(params["conv_w"].reshape(D, c_in * ksz).T),
        "conv_b": pad_v(params["conv_b"]),
        "tte0": pad_v(params["tte"][0]),
        "emb_ln_g": pad_v(params["emb_ln_g"]),
        "emb_ln_b": pad_v(params["emb_ln_b"]),
        "layers": [],
    }
    for lyr in params["layers"]:
        wq = (lyr["wq"] * scale)[:, perm]
        bq = (lyr["bq"] * scale)[perm]
        wk = lyr["wk"][:, perm]
        bk = lyr["bk"][perm]
        w_qkv = jnp.concatenate([wq, wk, lyr["wv"]], axis=1)
        b_qkv = jnp.concatenate([bq, bk, lyr["bv"]])
        packed["layers"].append({
            "w_qkv": pad_w(w_qkv), "b_qkv": pad_v(b_qkv),
            "wo": pad_w(lyr["wo"]), "bo": pad_v(lyr["bo"]),
            "ln1_g": pad_v(lyr["ln1_g"]), "ln1_b": pad_v(lyr["ln1_b"]),
            "w1": pad_w(lyr["w1"]), "b1": pad_v(lyr["b1"]),
            "w2": pad_w(lyr["w2"]), "b2": pad_v(lyr["b2"]),
            "ln2_g": pad_v(lyr["ln2_g"]), "ln2_b": pad_v(lyr["ln2_b"]),
        })
    return packed


def roformer_backbone(x, length, packed, *, stride, n_heads, d_model):
    B, C, L = x.shape
    assert L % stride == 0              # static (shape-level) check only
    T = L // stride
    Dh = d_model // n_heads

    tile_t, Tp = _pick_tile(T, 256, 16)
    R = B * Tp

    # NOTE: the PyTorch `length % stride == 0` assert is done host-side in
    # __main__; doing it here on a traced value would force a device sync.
    valid = (length // stride).astype(jnp.int32)                     # (B,)

    # --- CNNDownSampling (strided Conv1d, kernel==stride) as a patch matmul,
    # fused with RoFormer embeddings (inputs_embeds + token_type(0)) + LN.
    # TODO(synk): CNNDownSampling internals not given; modeled as
    # Conv1d(C->D, kernel=stride, stride=stride).
    patches = x.reshape(B, C, T, stride).transpose(0, 2, 1, 3).reshape(B, T, C * stride)
    if Tp != T:
        patches = jnp.pad(patches, ((0, 0), (0, Tp - T), (0, 0)))
    patches = patches.reshape(R, C * stride)
    h = dense_add_ln(patches, packed["conv_w"], packed["conv_b"],
                     packed["tte0"], packed["emb_ln_g"], packed["emb_ln_b"],
                     n_true=d_model)                                  # (R, Dp)

    sin, cos = build_rope(Tp, Dh)       # computed once, shared by all layers
    d3 = 3 * d_model

    for lyr in packed["layers"]:
        qkv = dense(h, lyr["w_qkv"], lyr["b_qkv"])[:, :d3]            # (R, 3D)
        qkv = qkv.reshape(B, Tp, 3, n_heads, Dh)
        # Rotary applied once per layer (XLA fuses it with the head transpose);
        # q is already pre-scaled by 1/sqrt(Dh) via the packed weight.
        q = _apply_rope(qkv[:, :, 0], sin, cos).transpose(0, 2, 1, 3).astype(jnp.bfloat16)
        k = _apply_rope(qkv[:, :, 1], sin, cos).transpose(0, 2, 1, 3).astype(jnp.bfloat16)
        v = qkv[:, :, 2].transpose(0, 2, 1, 3)
        ctx = flash_attention(q, k, v, valid, tile_t=tile_t)          # (B,H,Tp,Dh)
        ctx2d = ctx.transpose(0, 2, 1, 3).reshape(R, d_model)
        h = dense_add_ln(ctx2d, lyr["wo"], lyr["bo"], h,
                         lyr["ln1_g"], lyr["ln1_b"], n_true=d_model)
        ff = dense(h, lyr["w1"], lyr["b1"], activation="gelu")
        h = dense_add_ln(ff, lyr["w2"], lyr["b2"], h,
                         lyr["ln2_g"], lyr["ln2_b"], n_true=d_model)

    out = h[:, :d_model].reshape(B, Tp, d_model)[:, :T].astype(jnp.float32)
    return out                                                        # last_hidden_state


# ----------------------------- main ------------------------------------------

if __name__ == "__main__":
    key = jax.random.PRNGKey(0)
    B, C, L = 2, 4, 16          # batch, conv in-channels, raw sequence length
    STRIDE = 2                  # kwargs['stride']
    D, HEADS, FF, LAYERS = 32, 4, 64, 2   # embedding_dim == hidden_size

    k_x, k_p = jax.random.split(key)
    x = jax.random.normal(k_x, (B, C, L), jnp.float32)
    length = jnp.array([16, 12], dtype=jnp.int32)   # divisible by stride

    # Host-side precheck (kept out of the traced/jitted path).
    assert all(int(v) % STRIDE == 0 for v in length), "Length must be divisible by stride"

    params = init_params(k_p, C, STRIDE, D, FF, LAYERS)
    packed = pack_params(params, HEADS)

    fwd = jax.jit(functools.partial(roformer_backbone, stride=STRIDE,
                                    n_heads=HEADS, d_model=D))
    out = fwd(x, length, packed)
    jax.block_until_ready(out)
    assert out.shape == (B, L // STRIDE, D)
    assert bool(jnp.all(jnp.isfinite(out)))
    print("KERNEL_OK")
</pallas_src>

<mosaic_0001>
module attributes {stable_mosaic.version = 11 : i64} {
  func.func @_dense_kernel(%arg0: i32, %arg1: i32, %arg2: i32, %arg3: memref<16x128xbf16, #tpu.memory_space<vmem>>, %arg4: memref<128x128xbf16, #tpu.memory_space<vmem>>, %arg5: memref<1x128xf32, #tpu.memory_space<vmem>>, %arg6: memref<16x128xbf16, #tpu.memory_space<vmem>>, %arg7: memref<16x128xf32, #tpu.memory_space<vmem>>) attributes {dimension_semantics = [#tpu.dimension_semantics<parallel>, #tpu.dimension_semantics<parallel>, #tpu.dimension_semantics<arbitrary>], iteration_bounds = array<i64: 2, 1, 1>, scalar_prefetch = 0 : i64, scratch_operands = 1 : i64, tpu.core_type = #tpu.core_type<tc>, window_params = [{transform_indices = @transform_0, window_bounds = array<i64: 16, 128>}, {transform_indices = @transform_1, window_bounds = array<i64: 128, 128>}, {transform_indices = @transform_2, window_bounds = array<i64: 1, 128>}, {transform_indices = @transform_3, window_bounds = array<i64: 16, 128>}]} {
    %c0_i32 = arith.constant 0 : i32
    %0 = arith.cmpi eq, %arg2, %c0_i32 : i32
    %1 = arith.extui %0 : i1 to i32
    %c0_i32_0 = arith.constant 0 : i32
    %2 = arith.cmpi ne, %1, %c0_i32_0 : i32
    scf.if %2 {
      %cst_10 = arith.constant 0.000000e+00 : f32
      %12 = vector.broadcast %cst_10 : f32 to vector<16x128xf32>
      %c0_11 = arith.constant 0 : index
      %c0_12 = arith.constant 0 : index
      %13 = vector.load %arg7[%c0_11, %c0_12] : memref<16x128xf32, #tpu.memory_space<vmem>>, vector<16x128xf32>
      tpu.vector_store %arg7[%c0_11, %c0_12], %12 {strides = array<i32>} : memref<16x128xf32, #tpu.memory_space<vmem>>, vector<16x128xf32>,
    } else {
    }
    %c0 = arith.constant 0 : index
    %c0_1 = arith.constant 0 : index
    %3 = vector.load %arg7[%c0, %c0_1] : memref<16x128xf32, #tpu.memory_space<vmem>>, vector<16x128xf32>
    %c0_2 = arith.constant 0 : index
    %c0_3 = arith.constant 0 : index
    %4 = vector.load %arg3[%c0_2, %c0_3] : memref<16x128xbf16, #tpu.memory_space<vmem>>, vector<16x128xbf16>
    %c0_4 = arith.constant 0 : index
    %c0_5 = arith.constant 0 : index
    %5 = vector.load %arg4[%c0_4, %c0_5] : memref<128x128xbf16, #tpu.memory_space<vmem>>, vector<128x128xbf16>
    %cst = arith.constant dense<0.000000e+00> : vector<16x128xf32>
    %6 = tpu.matmul %4, %5, %cst {dimension_numbers = #tpu.dot_dimension_numbers<[1], [0], [0], [1], [0, 0, 1, 1], [], []>} : vector<16x128xbf16>, vector<128x128xbf16>, vector<16x128xf32> -> vector<16x128xf32>
    %7 = arith.addf %3, %6 : vector<16x128xf32>
    %c0_6 = arith.constant 0 : index
    %c0_7 = arith.constant 0 : index
    %8 = vector.load %arg7[%c0_6, %c0_7] : memref<16x128xf32, #tpu.memory_space<vmem>>, vector<16x128xf32>
    tpu.vector_store %arg7[%c0_6, %c0_7], %7 {strides = array<i32>} : memref<16x128xf32, #tpu.memory_space<vmem>>, vector<16x128xf32>,
    %c0_i32_8 = arith.constant 0 : i32
    %9 = arith.cmpi eq, %arg2, %c0_i32_8 : i32
    %10 = arith.extui %9 : i1 to i32
    %c0_i32_9 = arith.constant 0 : i32
    %11 = arith.cmpi ne, %10, %c0_i32_9 : i32
    scf.if %11 {
      %c0_10 = arith.constant 0 : index
      %c0_11 = arith.constant 0 : index
      %12 = vector.load %arg7[%c0_10, %c0_11] : memref<16x128xf32, #tpu.memory_space<vmem>>, vector<16x128xf32>
      %c0_12 = arith.constant 0 : index
      %c0_13 = arith.constant 0 : index
      %13 = vector.load %arg5[%c0_12, %c0_13] : memref<1x128xf32, #tpu.memory_space<vmem>>, vector<1x128xf32>
      %14 = vector.broadcast %13 : vector<1x128xf32> to vector<16x128xf32>
      %15 = arith.addf %12, %14 : vector<16x128xf32>
      %16 = arith.truncf %15 : vector<16x128xf32> to vector<16x128xbf16>
      %c0_14 = arith.constant 0 : index
      %c0_15 = arith.constant 0 : index
      %17 = vector.load %arg6[%c0_14, %c0_15] : memref<16x128xbf16, #tpu.memory_space<vmem>>, vector<16x128xbf16>
      tpu.vector_store %arg6[%c0_14, %c0_15], %16 {strides = array<i32>} : memref<16x128xbf16, #tpu.memory_space<vmem>>, vector<16x128xbf16>,
    } else {
    }
    return
  }
  func.func @transform_0(%arg0: i32, %arg1: i32, %arg2: i32) -> (i32, i32) {
    %c0_i32 = arith.constant 0 : i32
    return %arg0, %arg2 : i32, i32
  }
  func.func @transform_1(%arg0: i32, %arg1: i32, %arg2: i32) -> (i32, i32) {
    %c0_i32 = arith.constant 0 : i32
    return %arg2, %arg1 : i32, i32
  }
  func.func @transform_2(%arg0: i32, %arg1: i32, %arg2: i32) -> (i32, i32) {
    %c0_i32 = arith.constant 0 : i32
    %c0_i32_0 = arith.constant 0 : i32
    return %c0_i32, %arg1 : i32, i32
  }
  func.func @transform_3(%arg0: i32, %arg1: i32, %arg2: i32) -> (i32, i32) {
    %c0_i32 = arith.constant 0 : i32
    return %arg0, %arg1 : i32, i32
  }
}

module attributes {stable_mosaic.version = 11 : i64} {
  func.func @_dense_add_ln_kernel(%arg0: i32, %arg1: i32, %arg2: memref<16x128xbf16, #tpu.memory_space<vmem>>, %arg3: memref<128x128xbf16, #tpu.memory_space<vmem>>, %arg4: memref<1x128xf32, #tpu.memory_space<vmem>>, %arg5: memref<1x128xf32, #tpu.memory_space<vmem>>, %arg6: memref<1x128xf32, #tpu.memory_space<vmem>>, %arg7: memref<1x128xf32, #tpu.memory_space<vmem>>, %arg8: memref<16x128xbf16, #tpu.memory_space<vmem>>, %arg9: memref<16x128xf32, #tpu.memory_space<vmem>>) attributes {dimension_semantics = [#tpu.dimension_semantics<parallel>, #tpu.dimension_semantics<arbitrary>], iteration_bounds = array<i64: 2, 1>, scalar_prefetch = 0 : i64, scratch_operands = 1 : i64, tpu.core_type = #tpu.core_type<tc>, window_params = [{transform_indices = @transform_0, window_bounds = array<i64: 16, 128>}, {transform_indices = @transform_1, window_bounds = array<i64: 128, 128>}, {pipeline_mode = #tpu.pipeline_mode<synchronous>, transform_indices = @transform_2, window_bounds = array<i64: 1, 128>}, {pipeline_mode = #tpu.pipeline_mode<synchronous>, transform_indices = @transform_3, window_bounds = array<i64: 1, 128>}, {pipeline_mode = #tpu.pipeline_mode<synchronous>, transform_indices = @transform_4, window_bounds = array<i64: 1, 128>}, {pipeline_mode = #tpu.pipeline_mode<synchronous>, transform_indices = @transform_5, window_bounds = array<i64: 1, 128>}, {transform_indices = @transform_6, window_bounds = array<i64: 16, 128>}]} {
    %c0_i32 = arith.constant 0 : i32
    %0 = arith.cmpi eq, %arg1, %c0_i32 : i32
    %1 = arith.extui %0 : i1 to i32
    %c0_i32_0 = arith.constant 0 : i32
    %2 = arith.cmpi ne, %1, %c0_i32_0 : i32
    scf.if %2 {
      %cst_10 = arith.constant 0.000000e+00 : f32
      %12 = vector.broadcast %cst_10 : f32 to vector<16x128xf32>
      %c0_11 = arith.constant 0 : index
      %c0_12 = arith.constant 0 : index
      %13 = vector.load %arg9[%c0_11, %c0_12] : memref<16x128xf32, #tpu.memory_space<vmem>>, vector<16x128xf32>
      tpu.vector_store %arg9[%c0_11, %c0_12], %12 {strides = array<i32>} : memref<16x128xf32, #tpu.memory_space<vmem>>, vector<16x128xf32>,
    } else {
    }
    %c0 = arith.constant 0 : index
    %c0_1 = arith.constant 0 : index
    %3 = vector.load %arg9[%c0, %c0_1] : memref<16x128xf32, #tpu.memory_space<vmem>>, vector<16x128xf32>
    %c0_2 = arith.constant 0 : index
    %c0_3 = arith.constant 0 : index
    %4 = vector.load %arg2[%c0_2, %c0_3] : memref<16x128xbf16, #tpu.memory_space<vmem>>, vector<16x128xbf16>
    %c0_4 = arith.constant 0 : index
    %c0_5 = arith.constant 0 : index
    %5 = vector.load %arg3[%c0_4, %c0_5] : memref<128x128xbf16, #tpu.memory_space<vmem>>, vector<128x128xbf16>
    %cst = arith.constant dense<0.000000e+00> : vector<16x128xf32>
    %6 = tpu.matmul %4, %5, %cst {dimension_numbers = #tpu.dot_dimension_numbers<[1], [0], [0], [1], [0, 0, 1, 1], [], []>} : vector<16x128xbf16>, vector<128x128xbf16>, vector<16x128xf32> -> vector<16x128xf32>
    %7 = arith.addf %3, %6 : vector<16x128xf32>
    %c0_6 = arith.constant 0 : index
    %c0_7 = arith.constant 0 : index
    %8 = vector.load %arg9[%c0_6, %c0_7] : memref<16x128xf32, #tpu.memory_space<vmem>>, vector<16x128xf32>
    tpu.vector_store %arg9[%c0_6, %c0_7], %7 {strides = array<i32>} : memref<16x128xf32, #tpu.memory_space<vmem>>, vector<16x128xf32>,
    %c0_i32_8 = arith.constant 0 : i32
    %9 = arith.cmpi eq, %arg1, %c0_i32_8 : i32
    %10 = arith.extui %9 : i1 to i32
    %c0_i32_9 = arith.constant 0 : i32
    %11 = arith.cmpi ne, %10, %c0_i32_9 : i32
    scf.if %11 {
      %c0_10 = arith.constant 0 : index
      %c0_11 = arith.constant 0 : index
      %12 = vector.load %arg9[%c0_10, %c0_11] : memref<16x128xf32, #tpu.memory_space<vmem>>, vector<16x128xf32>
      %c0_12 = arith.constant 0 : index
      %c0_13 = arith.constant 0 : index
      %13 = vector.load %arg4[%c0_12, %c0_13] : memref<1x128xf32, #tpu.memory_space<vmem>>, vector<1x128xf32>
      %14 = vector.broadcast %13 : vector<1x128xf32> to vector<16x128xf32>
      %15 = arith.addf %12, %14 : vector<16x128xf32>
      %c0_14 = arith.constant 0 : index
      %c0_15 = arith.constant 0 : index
      %16 = vector.load %arg5[%c0_14, %c0_15] : memref<1x128xf32, #tpu.memory_space<vmem>>, vector<1x128xf32>
      %17 = vector.broadcast %16 : vector<1x128xf32> to vector<16x128xf32>
      %18 = arith.addf %15, %17 : vector<16x128xf32>
      %cst_16 = arith.constant dense<0.000000e+00> : vector<16xf32>
      %19 = vector.multi_reduction <add>, %18, %cst_16 [1] : vector<16x128xf32> to vector<16xf32>
      %20 = vector.shape_cast %19 : vector<16xf32> to vector<16x1xf32>
      %cst_17 = arith.constant 3.125000e-02 : f32
      %21 = vector.broadcast %cst_17 : f32 to vector<16x1xf32>
      %22 = arith.mulf %20, %21 : vector<16x1xf32>
      %23 = arith.mulf %18, %18 : vector<16x128xf32>
      %cst_18 = arith.constant dense<0.000000e+00> : vector<16xf32>
      %24 = vector.multi_reduction <add>, %23, %cst_18 [1] : vector<16x128xf32> to vector<16xf32>
      %25 = vector.shape_cast %24 : vector<16xf32> to vector<16x1xf32>
      %cst_19 = arith.constant 3.125000e-02 : f32
      %26 = vector.broadcast %cst_19 : f32 to vector<16x1xf32>
      %27 = arith.mulf %25, %26 : vector<16x1xf32>
      %28 = arith.mulf %22, %22 : vector<16x1xf32>
      %29 = arith.subf %27, %28 : vector<16x1xf32>
      %30 = vector.broadcast %22 : vector<16x1xf32> to vector<16x128xf32>
      %31 = arith.subf %18, %30 : vector<16x128xf32>
      %cst_20 = arith.constant 9.99999996E-13 : f32
      %32 = vector.broadcast %cst_20 : f32 to vector<16x1xf32>
      %33 = arith.addf %29, %32 : vector<16x1xf32>
      %34 = math.rsqrt %33 : vector<16x1xf32>
      %35 = vector.broadcast %34 : vector<16x1xf32> to vector<16x128xf32>
      %36 = arith.mulf %31, %35 : vector<16x128xf32>
      %c0_21 = arith.constant 0 : index
      %c0_22 = arith.constant 0 : index
      %37 = vector.load %arg6[%c0_21, %c0_22] : memref<1x128xf32, #tpu.memory_space<vmem>>, vector<1x128xf32>
      %38 = vector.broadcast %37 : vector<1x128xf32> to vector<16x128xf32>
      %39 = arith.mulf %36, %38 : vector<16x128xf32>
      %c0_23 = arith.constant 0 : index
      %c0_24 = arith.constant 0 : index
      %40 = vector.load %arg7[%c0_23, %c0_24] : memref<1x128xf32, #tpu.memory_space<vmem>>, vector<1x128xf32>
      %41 = vector.broadcast %40 : vector<1x128xf32> to vector<16x128xf32>
      %42 = arith.addf %39, %41 : vector<16x128xf32>
      %43 = arith.truncf %42 : vector<16x128xf32> to vector<16x128xbf16>
      %c0_25 = arith.constant 0 : index
      %c0_26 = arith.constant 0 : index
      %44 = vector.load %arg8[%c0_25, %c0_26] : memref<16x128xbf16, #tpu.memory_space<vmem>>, vector<16x128xbf16>
      tpu.vector_store %arg8[%c0_25, %c0_26], %43 {strides = array<i32>} : memref<16x128xbf16, #tpu.memory_space<vmem>>, vector<16x128xbf16>,
    } else {
    }
    return
  }
  func.func @transform_0(%arg0: i32, %arg1: i32) -> (i32, i32) {
    %c0_i32 = arith.constant 0 : i32
    return %arg0, %arg1 : i32, i32
  }
  func.func @transform_1(%arg0: i32, %arg1: i32) -> (i32, i32) {
    %c0_i32 = arith.constant 0 : i32
    %c0_i32_0 = arith.constant 0 : i32
    return %arg1, %c0_i32 : i32, i32
  }
  func.func @transform_2(%arg0: i32, %arg1: i32) -> (i32, i32) {
    %c0_i32 = arith.constant 0 : i32
    %c0_i32_0 = arith.constant 0 : i32
    %c0_i32_1 = arith.constant 0 : i32
    return %c0_i32, %c0_i32_0 : i32, i32
  }
  func.func @transform_3(%arg0: i32, %arg1: i32) -> (i32, i32) {
    %c0_i32 = arith.constant 0 : i32
    %c0_i32_0 = arith.constant 0 : i32
    %c0_i32_1 = arith.constant 0 : i32
    return %c0_i32, %c0_i32_0 : i32, i32
  }
  func.func @transform_4(%arg0: i32, %arg1: i32) -> (i32, i32) {
    %c0_i32 = arith.constant 0 : i32
    %c0_i32_0 = arith.constant 0 : i32
    %c0_i32_1 = arith.constant 0 : i32
    return %c0_i32, %c0_i32_0 : i32, i32
  }
  func.func @transform_5(%arg0: i32, %arg1: i32) -> (i32, i32) {
    %c0_i32 = arith.constant 0 : i32
    %c0_i32_0 = arith.constant 0 : i32
    %c0_i32_1 = arith.constant 0 : i32
    return %c0_i32, %c0_i32_0 : i32, i32
  }
  func.func @transform_6(%arg0: i32, %arg1: i32) -> (i32, i32) {
    %c0_i32 = arith.constant 0 : i32
    %c0_i32_0 = arith.constant 0 : i32
    return %arg0, %c0_i32 : i32, i32
  }
}

module attributes {stable_mosaic.version = 11 : i64} {
  func.func @_flash_attn_kernel(%arg0: i32, %arg1: i32, %arg2: i32, %arg3: memref<2xi32, #tpu.memory_space<smem>>, %arg4: memref<1x4x16x8xbf16, #tpu.memory_space<vmem>>, %arg5: memref<1x4x16x8xbf16, #tpu.memory_space<vmem>>, %arg6: memref<1x4x16x8xbf16, #tpu.memory_space<vmem>>, %arg7: memref<1x4x16x8xbf16, #tpu.memory_space<vmem>>, %arg8: memref<4x16x1xf32, #tpu.memory_space<vmem>>, %arg9: memref<4x16x1xf32, #tpu.memory_space<vmem>>, %arg10: memref<4x16x8xf32, #tpu.memory_space<vmem>>) attributes {dimension_semantics = [#tpu.dimension_semantics<parallel>, #tpu.dimension_semantics<parallel>, #tpu.dimension_semantics<arbitrary>], iteration_bounds = array<i64: 2, 1, 1>, scalar_prefetch = 1 : i64, scratch_operands = 3 : i64, tpu.core_type = #tpu.core_type<tc>, window_params = [{transform_indices = @transform_0, window_bounds = array<i64: 1, 4, 16, 8>}, {transform_indices = @transform_1, window_bounds = array<i64: 1, 4, 16, 8>}, {transform_indices = @transform_2, window_bounds = array<i64: 1, 4, 16, 8>}, {transform_indices = @transform_3, window_bounds = array<i64: 1, 4, 16, 8>}]} {
    %0 = arith.index_cast %arg0 : i32 to index
    %1 = memref.load %arg3[%0] : memref<2xi32, #tpu.memory_space<smem>>
    %c0_i32 = arith.constant 0 : i32
    %2 = arith.cmpi eq, %arg2, %c0_i32 : i32
    %3 = arith.extui %2 : i1 to i32
    %c0_i32_0 = arith.constant 0 : i32
    %4 = arith.cmpi ne, %3, %c0_i32_0 : i32
    scf.if %4 {
      %cst = arith.constant -1.000000e+30 : f32
      %12 = vector.broadcast %cst : f32 to vector<4x16x1xf32>
      %c0 = arith.constant 0 : index
      %c0_4 = arith.constant 0 : index
      %c0_5 = arith.constant 0 : index
      %13 = vector.load %arg8[%c0, %c0_4, %c0_5] : memref<4x16x1xf32, #tpu.memory_space<vmem>>, vector<4x16x1xf32>
      tpu.vector_store %arg8[%c0, %c0_4, %c0_5], %12 {strides = array<i32>} : memref<4x16x1xf32, #tpu.memory_space<vmem>>, vector<4x16x1xf32>,
      %cst_6 = arith.constant 0.000000e+00 : f32
      %14 = vector.broadcast %cst_6 : f32 to vector<4x16x1xf32>
      %c0_7 = arith.constant 0 : index
      %c0_8 = arith.constant 0 : index
      %c0_9 = arith.constant 0 : index
      %15 = vector.load %arg9[%c0_7, %c0_8, %c0_9] : memref<4x16x1xf32, #tpu.memory_space<vmem>>, vector<4x16x1xf32>
      tpu.vector_store %arg9[%c0_7, %c0_8, %c0_9], %14 {strides = array<i32>} : memref<4x16x1xf32, #tpu.memory_space<vmem>>, vector<4x16x1xf32>,
      %cst_10 = arith.constant 0.000000e+00 : f32
      %16 = vector.broadcast %cst_10 : f32 to vector<4x16x8xf32>
      %c0_11 = arith.constant 0 : index
      %c0_12 = arith.constant 0 : index
      %c0_13 = arith.constant 0 : index
      %17 = vector.load %arg10[%c0_11, %c0_12, %c0_13] : memref<4x16x8xf32, #tpu.memory_space<vmem>>, vector<4x16x8xf32>
      tpu.vector_store %arg10[%c0_11, %c0_12, %c0_13], %16 {strides = array<i32>} : memref<4x16x8xf32, #tpu.memory_space<vmem>>, vector<4x16x8xf32>,
    } else {
    }
    %c16_i32 = arith.constant 16 : i32
    %5 = arith.muli %arg2, %c16_i32 : i32
    %6 = arith.cmpi slt, %5, %1 : i32
    %7 = arith.extui %6 : i1 to i32
    %c0_i32_1 = arith.constant 0 : i32
    %8 = arith.cmpi ne, %7, %c0_i32_1 : i32
    scf.if %8 {
      %c0 = arith.constant 0 : index
      %c0_4 = arith.constant 0 : index
      %c0_5 = arith.constant 0 : index
      %c0_6 = arith.constant 0 : index
      %12 = vector.load %arg4[%c0, %c0_4, %c0_5, %c0_6] : memref<1x4x16x8xbf16, #tpu.memory_space<vmem>>, vector<1x4x16x8xbf16>
      %13 = vector.shape_cast %12 : vector<1x4x16x8xbf16> to vector<4x16x8xbf16>
      %c0_7 = arith.constant 0 : index
      %c0_8 = arith.constant 0 : index
      %c0_9 = arith.constant 0 : index
      %c0_10 = arith.constant 0 : index
      %14 = vector.load %arg5[%c0_7, %c0_8, %c0_9, %c0_10] : memref<1x4x16x8xbf16, #tpu.memory_space<vmem>>, vector<1x4x16x8xbf16>
      %15 = vector.shape_cast %14 : vector<1x4x16x8xbf16> to vector<4x16x8xbf16>
      %c0_11 = arith.constant 0 : index
      %c0_12 = arith.constant 0 : index
      %c0_13 = arith.constant 0 : index
      %c0_14 = arith.constant 0 : index
      %16 = vector.load %arg6[%c0_11, %c0_12, %c0_13, %c0_14] : memref<1x4x16x8xbf16, #tpu.memory_space<vmem>>, vector<1x4x16x8xbf16>
      %17 = vector.shape_cast %16 : vector<1x4x16x8xbf16> to vector<4x16x8xbf16>
      "tpu.trace_start"() <{level = 10 : i32, message = "hqd,hkd->hqk"}> : () -> ()
      %cst = arith.constant dense<0.000000e+00> : vector<4x16x16xf32>
      %18 = tpu.matmul %13, %15, %cst {dimension_numbers = #tpu.dot_dimension_numbers<[2], [2], [1], [1], [0, 0, 0, 1, 1, 1], [0], [0]>} : vector<4x16x8xbf16>, vector<4x16x8xbf16>, vector<4x16x16xf32> -> vector<4x16x16xf32>
      "tpu.trace_stop"() : () -> ()
      %19 = tpu.iota {dimensions = array<i32: 2>} : vector<1x16x16xi32>
      %c16_i32_15 = arith.constant 16 : i32
      %20 = arith.muli %arg2, %c16_i32_15 : i32
      %21 = vector.broadcast %20 : i32 to vector<1x16x16xi32>
      %22 = arith.addi %19, %21 : vector<1x16x16xi32>
      %23 = vector.broadcast %1 : i32 to vector<1x16x16xi32>
      %24 = arith.cmpi slt, %22, %23 : vector<1x16x16xi32>
      %cst_16 = arith.constant -1.000000e+30 : f32
      %25 = vector.shape_cast %24 : vector<1x16x16xi1> to vector<1x16x16xi1>
      %26 = vector.broadcast %25 : vector<1x16x16xi1> to vector<4x16x16xi1>
      %27 = vector.broadcast %cst_16 : f32 to vector<4x16x16xf32>
      %28 = arith.select %26, %18, %27 : vector<4x16x16xi1>, vector<4x16x16xf32>
      %c0_17 = arith.constant 0 : index
      %c0_18 = arith.constant 0 : index
      %c0_19 = arith.constant 0 : index
      %29 = vector.load %arg8[%c0_17, %c0_18, %c0_19] : memref<4x16x1xf32, #tpu.memory_space<vmem>>, vector<4x16x1xf32>
      %cst_20 = arith.constant dense<0xFF800000> : vector<4x16xf32>
      %30 = vector.multi_reduction <maximumf>, %28, %cst_20 [2] : vector<4x16x16xf32> to vector<4x16xf32>
      %31 = vector.shape_cast %30 : vector<4x16xf32> to vector<4x16x1xf32>
      %32 = arith.maximumf %29, %31 : vector<4x16x1xf32>
      %33 = arith.subf %29, %32 : vector<4x16x1xf32>
      %34 = math.exp %33 : vector<4x16x1xf32>
      %35 = vector.broadcast %32 : vector<4x16x1xf32> to vector<4x16x16xf32>
      %36 = arith.subf %28, %35 : vector<4x16x16xf32>
      %37 = math.exp %36 : vector<4x16x16xf32>
      %c0_21 = arith.constant 0 : index
      %c0_22 = arith.constant 0 : index
      %c0_23 = arith.constant 0 : index
      %38 = vector.load %arg9[%c0_21, %c0_22, %c0_23] : memref<4x16x1xf32, #tpu.memory_space<vmem>>, vector<4x16x1xf32>
      %39 = arith.mulf %34, %38 : vector<4x16x1xf32>
      %cst_24 = arith.constant dense<0.000000e+00> : vector<4x16xf32>
      %40 = vector.multi_reduction <add>, %37, %cst_24 [2] : vector<4x16x16xf32> to vector<4x16xf32>
      %41 = vector.shape_cast %40 : vector<4x16xf32> to vector<4x16x1xf32>
      %42 = arith.addf %39, %41 : vector<4x16x1xf32>
      %c0_25 = arith.constant 0 : index
      %c0_26 = arith.constant 0 : index
      %c0_27 = arith.constant 0 : index
      %43 = vector.load %arg9[%c0_25, %c0_26, %c0_27] : memref<4x16x1xf32, #tpu.memory_space<vmem>>, vector<4x16x1xf32>
      tpu.vector_store %arg9[%c0_25, %c0_26, %c0_27], %42 {strides = array<i32>} : memref<4x16x1xf32, #tpu.memory_space<vmem>>, vector<4x16x1xf32>,
      %c0_28 = arith.constant 0 : index
      %c0_29 = arith.constant 0 : index
      %c0_30 = arith.constant 0 : index
      %44 = vector.load %arg8[%c0_28, %c0_29, %c0_30] : memref<4x16x1xf32, #tpu.memory_space<vmem>>, vector<4x16x1xf32>
      tpu.vector_store %arg8[%c0_28, %c0_29, %c0_30], %32 {strides = array<i32>} : memref<4x16x1xf32, #tpu.memory_space<vmem>>, vector<4x16x1xf32>,
      %45 = arith.truncf %37 : vector<4x16x16xf32> to vector<4x16x16xbf16>
      "tpu.trace_start"() <{level = 10 : i32, message = "hqk,hkd->hqd"}> : () -> ()
      %cst_31 = arith.constant dense<0.000000e+00> : vector<4x16x8xf32>
      %46 = tpu.matmul %45, %17, %cst_31 {dimension_numbers = #tpu.dot_dimension_numbers<[2], [1], [1], [2], [0, 0, 0, 1, 1, 2], [0], [0]>} : vector<4x16x16xbf16>, vector<4x16x8xbf16>, vector<4x16x8xf32> -> vector<4x16x8xf32>
      "tpu.trace_stop"() : () -> ()
      %c0_32 = arith.constant 0 : index
      %c0_33 = arith.constant 0 : index
      %c0_34 = arith.constant 0 : index
      %47 = vector.load %arg10[%c0_32, %c0_33, %c0_34] : memref<4x16x8xf32, #tpu.memory_space<vmem>>, vector<4x16x8xf32>
      %48 = vector.broadcast %34 : vector<4x16x1xf32> to vector<4x16x8xf32>
      %49 = arith.mulf %48, %47 : vector<4x16x8xf32>
      %50 = arith.addf %49, %46 : vector<4x16x8xf32>
      %c0_35 = arith.constant 0 : index
      %c0_36 = arith.constant 0 : index
      %c0_37 = arith.constant 0 : index
      %51 = vector.load %arg10[%c0_35, %c0_36, %c0_37] : memref<4x16x8xf32, #tpu.memory_space<vmem>>, vector<4x16x8xf32>
      tpu.vector_store %arg10[%c0_35, %c0_36, %c0_37], %50 {strides = array<i32>} : memref<4x16x8xf32, #tpu.memory_space<vmem>>, vector<4x16x8xf32>,
    } else {
    }
    %c0_i32_2 = arith.constant 0 : i32
    %9 = arith.cmpi eq, %arg2, %c0_i32_2 : i32
    %10 = arith.extui %9 : i1 to i32
    %c0_i32_3 = arith.constant 0 : i32
    %11 = arith.cmpi ne, %10, %c0_i32_3 : i32
    scf.if %11 {
      %c0 = arith.constant 0 : index
      %c0_4 = arith.constant 0 : index
      %c0_5 = arith.constant 0 : index
      %12 = vector.load %arg10[%c0, %c0_4, %c0_5] : memref<4x16x8xf32, #tpu.memory_space<vmem>>, vector<4x16x8xf32>
      %c0_6 = arith.constant 0 : index
      %c0_7 = arith.constant 0 : index
      %c0_8 = arith.constant 0 : index
      %13 = vector.load %arg9[%c0_6, %c0_7, %c0_8] : memref<4x16x1xf32, #tpu.memory_space<vmem>>, vector<4x16x1xf32>
      %14 = tpu.reciprocal %13 {approx = true} : vector<4x16x1xf32> -> vector<4x16x1xf32>
      %15 = vector.broadcast %14 : vector<4x16x1xf32> to vector<4x16x8xf32>
      %16 = arith.mulf %12, %15 : vector<4x16x8xf32>
      %17 = arith.truncf %16 : vector<4x16x8xf32> to vector<4x16x8xbf16>
      %c0_9 = arith.constant 0 : index
      %c0_10 = arith.constant 0 : index
      %c0_11 = arith.constant 0 : index
      %c0_12 = arith.constant 0 : index
      %18 = vector.load %arg7[%c0_9, %c0_10, %c0_11, %c0_12] : memref<1x4x16x8xbf16, #tpu.memory_space<vmem>>, vector<1x4x16x8xbf16>
      %19 = vector.shape_cast %18 : vector<1x4x16x8xbf16> to vector<4x16x8xbf16>
      %20 = vector.shape_cast %17 : vector<4x16x8xbf16> to vector<1x4x16x8xbf16>
      tpu.vector_store %arg7[%c0_9, %c0_10, %c0_11, %c0_12], %20 {strides = array<i32>} : memref<1x4x16x8xbf16, #tpu.memory_space<vmem>>, vector<1x4x16x8xbf16>,
    } else {
    }
    return
  }
  func.func @transform_0(%arg0: i32, %arg1: i32, %arg2: i32, %arg3: memref<2xi32, #tpu.memory_space<smem>>) -> (i32, i32, i32, i32) {
    %c0_i32 = arith.constant 0 : i32
    %c0_i32_0 = arith.constant 0 : i32
    %c0_i32_1 = arith.constant 0 : i32
    return %arg0, %c0_i32, %arg1, %c0_i32_0 : i32, i32, i32, i32
  }
  func.func @transform_1(%arg0: i32, %arg1: i32, %arg2: i32, %arg3: memref<2xi32, #tpu.memory_space<smem>>) -> (i32, i32, i32, i32) {
    %c0_i32 = arith.constant 0 : i32
    %c0_i32_0 = arith.constant 0 : i32
    %c0_i32_1 = arith.constant 0 : i32
    return %arg0, %c0_i32, %arg2, %c0_i32_0 : i32, i32, i32, i32
  }
  func.func @transform_2(%arg0: i32, %arg1: i32, %arg2: i32, %arg3: memref<2xi32, #tpu.memory_space<smem>>) -> (i32, i32, i32, i32) {
    %c0_i32 = arith.constant 0 : i32
    %c0_i32_0 = arith.constant 0 : i32
    %c0_i32_1 = arith.constant 0 : i32
    return %arg0, %c0_i32, %arg2, %c0_i32_0 : i32, i32, i32, i32
  }
  func.func @transform_3(%arg0: i32, %arg1: i32, %arg2: i32, %arg3: memref<2xi32, #tpu.memory_space<smem>>) -> (i32, i32, i32, i32) {
    %c0_i32 = arith.constant 0 : i32
    %c0_i32_0 = arith.constant 0 : i32
    %c0_i32_1 = arith.constant 0 : i32
    return %arg0, %c0_i32, %arg1, %c0_i32_0 : i32, i32, i32, i32
  }
}

module attributes {stable_mosaic.version = 11 : i64} {
  func.func @_dense_add_ln_kernel(%arg0: i32, %arg1: i32, %arg2: memref<16x128xbf16, #tpu.memory_space<vmem>>, %arg3: memref<128x128xbf16, #tpu.memory_space<vmem>>, %arg4: memref<1x128xf32, #tpu.memory_space<vmem>>, %arg5: memref<16x128xbf16, #tpu.memory_space<vmem>>, %arg6: memref<1x128xf32, #tpu.memory_space<vmem>>, %arg7: memref<1x128xf32, #tpu.memory_space<vmem>>, %arg8: memref<16x128xbf16, #tpu.memory_space<vmem>>, %arg9: memref<16x128xf32, #tpu.memory_space<vmem>>) attributes {dimension_semantics = [#tpu.dimension_semantics<parallel>, #tpu.dimension_semantics<arbitrary>], iteration_bounds = array<i64: 2, 1>, scalar_prefetch = 0 : i64, scratch_operands = 1 : i64, tpu.core_type = #tpu.core_type<tc>, window_params = [{transform_indices = @transform_0, window_bounds = array<i64: 16, 128>}, {transform_indices = @transform_1, window_bounds = array<i64: 128, 128>}, {pipeline_mode = #tpu.pipeline_mode<synchronous>, transform_indices = @transform_2, window_bounds = array<i64: 1, 128>}, {transform_indices = @transform_3, window_bounds = array<i64: 16, 128>}, {pipeline_mode = #tpu.pipeline_mode<synchronous>, transform_indices = @transform_4, window_bounds = array<i64: 1, 128>}, {pipeline_mode = #tpu.pipeline_mode<synchronous>, transform_indices = @transform_5, window_bounds = array<i64: 1, 128>}, {transform_indices = @transform_6, window_bounds = array<i64: 16, 128>}]} {
    %c0_i32 = arith.constant 0 : i32
    %0 = arith.cmpi eq, %arg1, %c0_i32 : i32
    %1 = arith.extui %0 : i1 to i32
    %c0_i32_0 = arith.constant 0 : i32
    %2 = arith.cmpi ne, %1, %c0_i32_0 : i32
    scf.if %2 {
      %cst_10 = arith.constant 0.000000e+00 : f32
      %12 = vector.broadcast %cst_10 : f32 to vector<16x128xf32>
      %c0_11 = arith.constant 0 : index
      %c0_12 = arith.constant 0 : index
      %13 = vector.load %arg9[%c0_11, %c0_12] : memref<16x128xf32, #tpu.memory_space<vmem>>, vector<16x128xf32>
      tpu.vector_store %arg9[%c0_11, %c0_12], %12 {strides = array<i32>} : memref<16x128xf32, #tpu.memory_space<vmem>>, vector<16x128xf32>,
    } else {
    }
    %c0 = arith.constant 0 : index
    %c0_1 = arith.constant 0 : index
    %3 = vector.load %arg9[%c0, %c0_1] : memref<16x128xf32, #tpu.memory_space<vmem>>, vector<16x128xf32>
    %c0_2 = arith.constant 0 : index
    %c0_3 = arith.constant 0 : index
    %4 = vector.load %arg2[%c0_2, %c0_3] : memref<16x128xbf16, #tpu.memory_space<vmem>>, vector<16x128xbf16>
    %c0_4 = arith.constant 0 : index
    %c0_5 = arith.constant 0 : index
    %5 = vector.load %arg3[%c0_4, %c0_5] : memref<128x128xbf16, #tpu.memory_space<vmem>>, vector<128x128xbf16>
    %cst = arith.constant dense<0.000000e+00> : vector<16x128xf32>
    %6 = tpu.matmul %4, %5, %cst {dimension_numbers = #tpu.dot_dimension_numbers<[1], [0], [0], [1], [0, 0, 1, 1], [], []>} : vector<16x128xbf16>, vector<128x128xbf16>, vector<16x128xf32> -> vector<16x128xf32>
    %7 = arith.addf %3, %6 : vector<16x128xf32>
    %c0_6 = arith.constant 0 : index
    %c0_7 = arith.constant 0 : index
    %8 = vector.load %arg9[%c0_6, %c0_7] : memref<16x128xf32, #tpu.memory_space<vmem>>, vector<16x128xf32>
    tpu.vector_store %arg9[%c0_6, %c0_7], %7 {strides = array<i32>} : memref<16x128xf32, #tpu.memory_space<vmem>>, vector<16x128xf32>,
    %c0_i32_8 = arith.constant 0 : i32
    %9 = arith.cmpi eq, %arg1, %c0_i32_8 : i32
    %10 = arith.extui %9 : i1 to i32
    %c0_i32_9 = arith.constant 0 : i32
    %11 = arith.cmpi ne, %10, %c0_i32_9 : i32
    scf.if %11 {
      %c0_10 = arith.constant 0 : index
      %c0_11 = arith.constant 0 : index
      %12 = vector.load %arg9[%c0_10, %c0_11] : memref<16x128xf32, #tpu.memory_space<vmem>>, vector<16x128xf32>
      %c0_12 = arith.constant 0 : index
      %c0_13 = arith.constant 0 : index
      %13 = vector.load %arg4[%c0_12, %c0_13] : memref<1x128xf32, #tpu.memory_space<vmem>>, vector<1x128xf32>
      %14 = vector.broadcast %13 : vector<1x128xf32> to vector<16x128xf32>
      %15 = arith.addf %12, %14 : vector<16x128xf32>
      %c0_14 = arith.constant 0 : index
      %c0_15 = arith.constant 0 : index
      %16 = vector.load %arg5[%c0_14, %c0_15] : memref<16x128xbf16, #tpu.memory_space<vmem>>, vector<16x128xbf16>
      %17 = arith.extf %16 : vector<16x128xbf16> to vector<16x128xf32>
      %18 = arith.addf %15, %17 : vector<16x128xf32>
      %cst_16 = arith.constant dense<0.000000e+00> : vector<16xf32>
      %19 = vector.multi_reduction <add>, %18, %cst_16 [1] : vector<16x128xf32> to vector<16xf32>
      %20 = vector.shape_cast %19 : vector<16xf32> to vector<16x1xf32>
      %cst_17 = arith.constant 3.125000e-02 : f32
      %21 = vector.broadcast %cst_17 : f32 to vector<16x1xf32>
      %22 = arith.mulf %20, %21 : vector<16x1xf32>
      %23 = arith.mulf %18, %18 : vector<16x128xf32>
      %cst_18 = arith.constant dense<0.000000e+00> : vector<16xf32>
      %24 = vector.multi_reduction <add>, %23, %cst_18 [1] : vector<16x128xf32> to vector<16xf32>
      %25 = vector.shape_cast %24 : vector<16xf32> to vector<16x1xf32>
      %cst_19 = arith.constant 3.125000e-02 : f32
      %26 = vector.broadcast %cst_19 : f32 to vector<16x1xf32>
      %27 = arith.mulf %25, %26 : vector<16x1xf32>
      %28 = arith.mulf %22, %22 : vector<16x1xf32>
      %29 = arith.subf %27, %28 : vector<16x1xf32>
      %30 = vector.broadcast %22 : vector<16x1xf32> to vector<16x128xf32>
      %31 = arith.subf %18, %30 : vector<16x128xf32>
      %cst_20 = arith.constant 9.99999996E-13 : f32
      %32 = vector.broadcast %cst_20 : f32 to vector<16x1xf32>
      %33 = arith.addf %29, %32 : vector<16x1xf32>
      %34 = math.rsqrt %33 : vector<16x1xf32>
      %35 = vector.broadcast %34 : vector<16x1xf32> to vector<16x128xf32>
      %36 = arith.mulf %31, %35 : vector<16x128xf32>
      %c0_21 = arith.constant 0 : index
      %c0_22 = arith.constant 0 : index
      %37 = vector.load %arg6[%c0_21, %c0_22] : memref<1x128xf32, #tpu.memory_space<vmem>>, vector<1x128xf32>
      %38 = vector.broadcast %37 : vector<1x128xf32> to vector<16x128xf32>
      %39 = arith.mulf %36, %38 : vector<16x128xf32>
      %c0_23 = arith.constant 0 : index
      %c0_24 = arith.constant 0 : index
      %40 = vector.load %arg7[%c0_23, %c0_24] : memref<1x128xf32, #tpu.memory_space<vmem>>, vector<1x128xf32>
      %41 = vector.broadcast %40 : vector<1x128xf32> to vector<16x128xf32>
      %42 = arith.addf %39, %41 : vector<16x128xf32>
      %43 = arith.truncf %42 : vector<16x128xf32> to vector<16x128xbf16>
      %c0_25 = arith.constant 0 : index
      %c0_26 = arith.constant 0 : index
      %44 = vector.load %arg8[%c0_25, %c0_26] : memref<16x128xbf16, #tpu.memory_space<vmem>>, vector<16x128xbf16>
      tpu.vector_store %arg8[%c0_25, %c0_26], %43 {strides = array<i32>} : memref<16x128xbf16, #tpu.memory_space<vmem>>, vector<16x128xbf16>,
    } else {
    }
    return
  }
  func.func @transform_0(%arg0: i32, %arg1: i32) -> (i32, i32) {
    %c0_i32 = arith.constant 0 : i32
    return %arg0, %arg1 : i32, i32
  }
  func.func @transform_1(%arg0: i32, %arg1: i32) -> (i32, i32) {
    %c0_i32 = arith.constant 0 : i32
    %c0_i32_0 = arith.constant 0 : i32
    return %arg1, %c0_i32 : i32, i32
  }
  func.func @transform_2(%arg0: i32, %arg1: i32) -> (i32, i32) {
    %c0_i32 = arith.constant 0 : i32
    %c0_i32_0 = arith.constant 0 : i32
    %c0_i32_1 = arith.constant 0 : i32
    return %c0_i32, %c0_i32_0 : i32, i32
  }
  func.func @transform_3(%arg0: i32, %arg1: i32) -> (i32, i32) {
    %c0_i32 = arith.constant 0 : i32
    %c0_i32_0 = arith.constant 0 : i32
    return %arg0, %c0_i32 : i32, i32
  }
  func.func @transform_4(%arg0: i32, %arg1: i32) -> (i32, i32) {
    %c0_i32 = arith.constant 0 : i32
    %c0_i32_0 = arith.constant 0 : i32
    %c0_i32_1 = arith.constant 0 : i32
    return %c0_i32, %c0_i32_0 : i32, i32
  }
  func.func @transform_5(%arg0: i32, %arg1: i32) -> (i32, i32) {
    %c0_i32 = arith.constant 0 : i32
    %c0_i32_0 = arith.constant 0 : i32
    %c0_i32_1 = arith.constant 0 : i32
    return %c0_i32, %c0_i32_0 : i32, i32
  }
  func.func @transform_6(%arg0: i32, %arg1: i32) -> (i32, i32) {
    %c0_i32 = arith.constant 0 : i32
    %c0_i32_0 = arith.constant 0 : i32
    return %arg0, %c0_i32 : i32, i32
  }
}

module attributes {stable_mosaic.version = 11 : i64} {
  func.func @_dense_kernel(%arg0: i32, %arg1: i32, %arg2: i32, %arg3: memref<16x128xbf16, #tpu.memory_space<vmem>>, %arg4: memref<128x128xbf16, #tpu.memory_space<vmem>>, %arg5: memref<1x128xf32, #tpu.memory_space<vmem>>, %arg6: memref<16x128xbf16, #tpu.memory_space<vmem>>, %arg7: memref<16x128xf32, #tpu.memory_space<vmem>>) attributes {dimension_semantics = [#tpu.dimension_semantics<parallel>, #tpu.dimension_semantics<parallel>, #tpu.dimension_semantics<arbitrary>], iteration_bounds = array<i64: 2, 1, 1>, scalar_prefetch = 0 : i64, scratch_operands = 1 : i64, tpu.core_type = #tpu.core_type<tc>, window_params = [{transform_indices = @transform_0, window_bounds = array<i64: 16, 128>}, {transform_indices = @transform_1, window_bounds = array<i64: 128, 128>}, {transform_indices = @transform_2, window_bounds = array<i64: 1, 128>}, {transform_indices = @transform_3, window_bounds = array<i64: 16, 128>}]} {
    %c0_i32 = arith.constant 0 : i32
    %0 = arith.cmpi eq, %arg2, %c0_i32 : i32
    %1 = arith.extui %0 : i1 to i32
    %c0_i32_0 = arith.constant 0 : i32
    %2 = arith.cmpi ne, %1, %c0_i32_0 : i32
    scf.if %2 {
      %cst_10 = arith.constant 0.000000e+00 : f32
      %12 = vector.broadcast %cst_10 : f32 to vector<16x128xf32>
      %c0_11 = arith.constant 0 : index
      %c0_12 = arith.constant 0 : index
      %13 = vector.load %arg7[%c0_11, %c0_12] : memref<16x128xf32, #tpu.memory_space<vmem>>, vector<16x128xf32>
      tpu.vector_store %arg7[%c0_11, %c0_12], %12 {strides = array<i32>} : memref<16x128xf32, #tpu.memory_space<vmem>>, vector<16x128xf32>,
    } else {
    }
    %c0 = arith.constant 0 : index
    %c0_1 = arith.constant 0 : index
    %3 = vector.load %arg7[%c0, %c0_1] : memref<16x128xf32, #tpu.memory_space<vmem>>, vector<16x128xf32>
    %c0_2 = arith.constant 0 : index
    %c0_3 = arith.constant 0 : index
    %4 = vector.load %arg3[%c0_2, %c0_3] : memref<16x128xbf16, #tpu.memory_space<vmem>>, vector<16x128xbf16>
    %c0_4 = arith.constant 0 : index
    %c0_5 = arith.constant 0 : index
    %5 = vector.load %arg4[%c0_4, %c0_5] : memref<128x128xbf16, #tpu.memory_space<vmem>>, vector<128x128xbf16>
    %cst = arith.constant dense<0.000000e+00> : vector<16x128xf32>
    %6 = tpu.matmul %4, %5, %cst {dimension_numbers = #tpu.dot_dimension_numbers<[1], [0], [0], [1], [0, 0, 1, 1], [], []>} : vector<16x128xbf16>, vector<128x128xbf16>, vector<16x128xf32> -> vector<16x128xf32>
    %7 = arith.addf %3, %6 : vector<16x128xf32>
    %c0_6 = arith.constant 0 : index
    %c0_7 = arith.constant 0 : index
    %8 = vector.load %arg7[%c0_6, %c0_7] : memref<16x128xf32, #tpu.memory_space<vmem>>, vector<16x128xf32>
    tpu.vector_store %arg7[%c0_6, %c0_7], %7 {strides = array<i32>} : memref<16x128xf32, #tpu.memory_space<vmem>>, vector<16x128xf32>,
    %c0_i32_8 = arith.constant 0 : i32
    %9 = arith.cmpi eq, %arg2, %c0_i32_8 : i32
    %10 = arith.extui %9 : i1 to i32
    %c0_i32_9 = arith.constant 0 : i32
    %11 = arith.cmpi ne, %10, %c0_i32_9 : i32
    scf.if %11 {
      %c0_10 = arith.constant 0 : index
      %c0_11 = arith.constant 0 : index
      %12 = vector.load %arg7[%c0_10, %c0_11] : memref<16x128xf32, #tpu.memory_space<vmem>>, vector<16x128xf32>
      %c0_12 = arith.constant 0 : index
      %c0_13 = arith.constant 0 : index
      %13 = vector.load %arg5[%c0_12, %c0_13] : memref<1x128xf32, #tpu.memory_space<vmem>>, vector<1x128xf32>
      %14 = vector.broadcast %13 : vector<1x128xf32> to vector<16x128xf32>
      %15 = arith.addf %12, %14 : vector<16x128xf32>
      %cst_14 = arith.constant 5.000000e-01 : f32
      %16 = vector.broadcast %cst_14 : f32 to vector<16x128xf32>
      %17 = arith.mulf %16, %15 : vector<16x128xf32>
      %cst_15 = arith.constant 4.471500e-02 : f32
      %18 = vector.broadcast %cst_15 : f32 to vector<16x128xf32>
      %19 = arith.mulf %18, %15 : vector<16x128xf32>
      %20 = arith.mulf %19, %15 : vector<16x128xf32>
      %21 = arith.mulf %20, %15 : vector<16x128xf32>
      %22 = arith.addf %15, %21 : vector<16x128xf32>
      %cst_16 = arith.constant 0.797884583 : f32
      %23 = vector.broadcast %cst_16 : f32 to vector<16x128xf32>
      %24 = arith.mulf %23, %22 : vector<16x128xf32>
      %25 = math.tanh %24 : vector<16x128xf32>
      %cst_17 = arith.constant 1.000000e+00 : f32
      %26 = vector.broadcast %cst_17 : f32 to vector<16x128xf32>
      %27 = arith.addf %26, %25 : vector<16x128xf32>
      %28 = arith.mulf %17, %27 : vector<16x128xf32>
      %29 = arith.truncf %28 : vector<16x128xf32> to vector<16x128xbf16>
      %c0_18 = arith.constant 0 : index
      %c0_19 = arith.constant 0 : index
      %30 = vector.load %arg6[%c0_18, %c0_19] : memref<16x128xbf16, #tpu.memory_space<vmem>>, vector<16x128xbf16>
      tpu.vector_store %arg6[%c0_18, %c0_19], %29 {strides = array<i32>} : memref<16x128xbf16, #tpu.memory_space<vmem>>, vector<16x128xbf16>,
    } else {
    }
    return
  }
  func.func @transform_0(%arg0: i32, %arg1: i32, %arg2: i32) -> (i32, i32) {
    %c0_i32 = arith.constant 0 : i32
    return %arg0, %arg2 : i32, i32
  }
  func.func @transform_1(%arg0: i32, %arg1: i32, %arg2: i32) -> (i32, i32) {
    %c0_i32 = arith.constant 0 : i32
    return %arg2, %arg1 : i32, i32
  }
  func.func @transform_2(%arg0: i32, %arg1: i32, %arg2: i32) -> (i32, i32) {
    %c0_i32 = arith.constant 0 : i32
    %c0_i32_0 = arith.constant 0 : i32
    return %c0_i32, %arg1 : i32, i32
  }
  func.func @transform_3(%arg0: i32, %arg1: i32, %arg2: i32) -> (i32, i32) {
    %c0_i32 = arith.constant 0 : i32
    return %arg0, %arg1 : i32, i32
  }
}

</mosaic_0001>

<bundles_post_ra>
// kernel: roformer_backbone.11
= control target key start
LH: loop header
LB: loop body
LE: loop exit
PB: predicated region body
PF: predicated region fallthrough
CT: control target
= control target key end

     0   :  { %s711_s21 = smov 0   ;;  %s713_s22 = smov 0   ;;  %s787_s0 = inlined_call_operand.vmem [shape: bf16[32,128], index: 0, kind: input, shape index: {}]   ;;  %s788_s1 = inlined_call_operand.vmem [shape: bf16[128,128], index: 1, kind: input, shape index: {}]   ;;  %s789_s2 = inlined_call_operand.vmem [shape: f32[1,128], index: 2, kind: input, shape index: {}]   ;;  %s790_s3 = inlined_call_operand.vmem [shape: f32[1,128], index: 3, kind: input, shape index: {}]   ;;  %s791_s4 = inlined_call_operand.vmem [shape: f32[1,128], index: 4, kind: input, shape index: {}]   ;;  %s792_s5 = inlined_call_operand.vmem [shape: f32[1,128], index: 5, kind: input, shape index: {}]   ;;  %s793_s6 = inlined_call_operand.vmem [shape: bf16[32,128], index: 6, kind: output, shape index: {}]  }
   0x1   :  { %s715_s23 = smov 0  }
   0x2 LB: > { %s28_s24 = sadd.s32 1, %s670_s22  ;;  %p563_p0 = scmp.ge.s32.totalorder %s674_s23, 1  ;;  %s674_s23 = sphi %s715_s23, %s16_s23   ;;  %s670_s22 = sphi %s713_s22, %s795_s22   ;;  %s666_s21 = sphi %s711_s21, %s794_s21  }
   0x3   : > { %p30_p1 = scmp.ge.s32.totalorder %s28_s24, 2  ;;  %p241_p2 = scmp.lt.s32.totalorder %s674_s23, 3 }
   0x5   : > { %s797_s24 = smov (%p30_p1, %s28_s24), 0  ;;  %p242_p3 = pnand %p563_p0, %p241_p2 }
   0x6   : > { %s564_s9 = sshll.u32 (!%p242_p3), %s666_s21, 1 }
   0x7   : > { %245 = sbr.rel (%p242_p3) target bundleno = 333 (0x14d), region = 44  ;;  %p280_p4 = scmp.lt.s32.totalorder (!%p242_p3), %s564_s9, 3 }
   0xc   : > { %v614_v0 = vld [vmem:[%s788_s1 + $0x38] sm:$0xff]  ;;  %v613_v1 = vld [vmem:[%s788_s1 + $0x30] sm:$0xff]  ;;  %v612_v2 = vld [vmem:[%s788_s1 + $0x28] sm:$0xff]  ;;  %s799_s9 = smov (!%p280_p4, %s564_s9), 3 }
   0xd   : > { %380 = vmatpush.bf16.msra.mxu0 %v614_v0  ;;  %v611_v3 = vld [vmem:[%s788_s1 + $0x20] sm:$0xff]  ;;  %v610_v4 = vld [vmem:[%s788_s1 + $0x18] sm:$0xff]  ;;  %v609_v5 = vld [vmem:[%s788_s1 + $0x10] sm:$0xff]  ;;  %s565_s16 = sshll.u32 %s799_s9, 2 }
   0xe   : > { %v608_v6 = vld [vmem:[%s788_s1 + $0x8] sm:$0xff]  ;;  %v607_v7 = vld [vmem:[%s788_s1] sm:$0xff]  ;;  %s286_s21 = scalar_lea.vmem %s787_s0, %s565_s16  ;;  %s298_s12 = scalar_lea.vmem %s793_s6, %s565_s16 }
   0xf   : > { %v606_v8 = vld [vmem:[%s286_s21] sm:$0xff] }
  0x10   : > { %v644_v9 = vld [vmem:[%s789_s2] ss:$0 sm:$0xff] }
  0x11   : > { %381 = vmatpush.bf16.msra.mxu0 %v613_v1  ;;  %v645_v10 = vld [vmem:[%s790_s3] ss:$0 sm:$0xff] }
  0x12   : > { %v646_v46 = vld [vmem:[%s791_s4] ss:$0 sm:$0xff] }
  0x13   : > { %v647_v51 = vld [vmem:[%s792_s5] ss:$0 sm:$0xff] }
  0x15   : > { %382 = vmatpush.bf16.msra.mxu0 %v612_v2 }
  0x19   : > { %383 = vmatpush.bf16.msra.mxu0 %v611_v3 }
  0x1d   : > { %384 = vmatpush.bf16.msra.mxu0 %v610_v4 }
  0x21   : > { %385 = vmatpush.bf16.msra.mxu0 %v609_v5 }
  0x25   : > { %386 = vmatpush.bf16.msra.mxu0 %v608_v6 }
  0x29   : > { %387 = vmatpush.bf16.msra.mxu0 %v607_v7 }
  0x2c   : > { %388 = vmatmul.bf16.vlgmr.msra.gmra.mxu0 %v606_v8 }
  0xa9   : > { %v389_v11 = vpop.f32.mrf.mxu0 }
  0xaa   : > { %v407_v12 = vadd.f32 %v644_v9, %v389_v11 }
  0xac   : > { %v413_v13 = vadd.f32 %v645_v10, %v407_v12 }
  0xae   : > { %415 = vadd.xlane.f32.xlu0 %v413_v13  ;;  %v421_v14 = vmul.f32 %v413_v13, %v413_v13 }
  0xb0   : > { %423 = vadd.xlane.f32.xlu1 %v421_v14 }
  0xb1   : > { %v391_v15 = vpop.f32.mrf.mxu0 }
  0xb2   : > { %v408_v16 = vadd.f32 %v644_v9, %v391_v15 }
  0xb4   : > { %v414_v17 = vadd.f32 %v645_v10, %v408_v16 }
  0xb6   : > { %417 = vadd.xlane.f32.xlu0 %v414_v17  ;;  %v422_v18 = vmul.f32 %v414_v17, %v414_v17 }
  0xb8   : > { %425 = vadd.xlane.f32.xlu1 %v422_v18 }
 0x121   : > { %v416_v19 = vpop.xlane.xlu0 %415 }
 0x122   : > { %v419_v20 = vmul.f32 0.03125, %v416_v19 }
 0x123   : > { %v424_v21 = vpop.xlane.xlu1 %423 }
 0x124   : > { %v429_v22 = vmul.f32 %v419_v20, %v419_v20  ;;  %v427_v23 = vmul.f32 0.03125, %v424_v21  ;;  %v433_v44 = vsub.f32 %v413_v13, %v419_v20 }
 0x126   : > { %v431_v24 = vsub.f32 %v427_v23, %v429_v22 }
 0x128   : > { %v435_v25 = vadd.f32 1e-12, %v431_v24 }
 0x129   : > { %v418_v26 = vpop.xlane.xlu0 %417 }
 0x12a   : > { %648 = vrsqrt.f32 %v435_v25  ;;  %v420_v27 = vmul.f32 0.03125, %v418_v26  ;;  %vm443_vm1 = vweird.f32 %v435_v25 }
 0x12b   : > { %v426_v28 = vpop.xlane.xlu1 %425 }
 0x12c   : > { %v430_v29 = vmul.f32 %v420_v27, %v420_v27  ;;  %v428_v30 = vmul.f32 0.03125, %v426_v28  ;;  %v434_v49 = vsub.f32 %v414_v17, %v420_v27 }
 0x12e   : > { %v432_v31 = vsub.f32 %v428_v30, %v430_v29 }
 0x130   : > { %v649_v32 = vpop.eup %648  ;;  %v436_v33 = vadd.f32 1e-12, %v432_v31 }
 0x131   : > { %v438_v34 = vmul.f32 %v649_v32, %v435_v25  ;;  %vm444_vm0 = vweird.f32 %v649_v32 }
 0x132   : > { %650 = vrsqrt.f32 %v436_v33  ;;  %vm445_vm2 = vmor %vm443_vm1, %vm444_vm0  ;;  %vm453_vm4 = vweird.f32 %v436_v33 }
 0x133   : > { %v439_v35 = vmul.f32 %v649_v32, %v438_v34 }
 0x135   : > { %v440_v36 = vmul.f32 0.5, %v439_v35 }
 0x137   : > { %v441_v37 = vsub.f32 1.5, %v440_v36 }
 0x138   : > { %v651_v38 = vpop.eup %650 }
 0x139   : > { %v442_v39 = vmul.f32 %v649_v32, %v441_v37  ;;  %v448_v40 = vmul.f32 %v651_v38, %v436_v33  ;;  %vm454_vm3 = vweird.f32 %v651_v38 }
 0x13a   : > { %vm455_vm5 = vmor %vm453_vm4, %vm454_vm3 }
 0x13b   : > { %v449_v41 = vmul.f32 %v651_v38, %v448_v40  ;;  %v446_v42 = vsel %vm445_vm2, %v649_v32, %v442_v39 }
 0x13c   : > { %v457_v47 = vmul.f32 %v446_v42, %v433_v44 }
 0x13d   : > { %v450_v43 = vmul.f32 0.5, %v449_v41 }
 0x13e   : > { %v463_v52 = vmul.f32 %v646_v46, %v457_v47 }
 0x13f   : > { %v451_v45 = vsub.f32 1.5, %v450_v43 }
 0x140   : > { %v469_v55 = vadd.f32 %v647_v51, %v463_v52 }
 0x141   : > { %v452_v48 = vmul.f32 %v651_v38, %v451_v45 }
 0x143   : > { %v456_v50 = vsel %vm455_vm5, %v651_v38, %v452_v48 }
 0x144   : > { %v458_v53 = vmul.f32 %v456_v50, %v434_v49 }
 0x146   : > { %v464_v54 = vmul.f32 %v646_v46, %v458_v53 }
 0x148   : > { %v470_v56 = vadd.f32 %v647_v51, %v464_v54 }
 0x14a   : > { %v618_v57 = vpack.c.bf16 %v470_v56, %v469_v55 }
 0x14c   : > { %619 = vst [vmem:[%s298_s12] sm:$0xff] %v618_v57  }
 0x14d PF: > { %s16_s23 = sadd.s32 1, %s674_s23   ;;  %s794_s21 = smov %s670_s22 }
 0x14e   : > { %p13_p5 = scmp.ge.s32.totalorder %s16_s23, 4   ;;  %s795_s22 = smov %s797_s24 }
 0x150   :  { %15 = sbr.rel (!%p13_p5) target bundleno = 2 (0x2), region = 85 }

// kernel: roformer_backbone.12
= control target key start
LH: loop header
LB: loop body
LE: loop exit
PB: predicated region body
PF: predicated region fallthrough
CT: control target
= control target key end

     0   :  { %s615_s12 = smov 0   ;;  %s617_s13 = smov 0   ;;  %s675_s0 = inlined_call_operand.vmem [shape: bf16[32,128], index: 0, kind: input, shape index: {}]   ;;  %s676_s1 = inlined_call_operand.vmem [shape: bf16[128,128], index: 1, kind: input, shape index: {}]   ;;  %s677_s2 = inlined_call_operand.vmem [shape: f32[1,128], index: 2, kind: input, shape index: {}]   ;;  %s678_s3 = inlined_call_operand.vmem [shape: bf16[32,128], index: 3, kind: output, shape index: {}]  }
   0x1   :  { %s619_s14 = smov 0  }
   0x2 LB: > { %s32_s15 = sadd.s32 1, %s589_s13  ;;  %p489_p0 = scmp.ge.s32.totalorder %s593_s14, 1  ;;  %s593_s14 = sphi %s619_s14, %s13_s14   ;;  %s589_s13 = sphi %s617_s13, %s680_s13   ;;  %s585_s12 = sphi %s615_s12, %s679_s12  }
   0x3   : > { %p34_p1 = scmp.ge.s32.totalorder %s32_s15, 2  ;;  %p188_p2 = scmp.lt.s32.totalorder %s593_s14, 3 }
   0x5   : > { %s682_s15 = smov (%p34_p1, %s32_s15), 0  ;;  %p189_p3 = pnand %p489_p0, %p188_p2 }
   0x6   : > { %s490_s24 = sshll.u32 (!%p189_p3), %s585_s12, 1 }
   0x7   : > { %192 = sbr.rel (%p189_p3) target bundleno = 183 (0xb7), region = 32  ;;  %p230_p4 = scmp.lt.s32.totalorder (!%p189_p3), %s490_s24, 3 }
   0xc   : > { %v540_v0 = vld [vmem:[%s676_s1 + $0x38] sm:$0xff]  ;;  %v539_v1 = vld [vmem:[%s676_s1 + $0x30] sm:$0xff]  ;;  %v538_v2 = vld [vmem:[%s676_s1 + $0x28] sm:$0xff]  ;;  %s684_s24 = smov (!%p230_p4, %s490_s24), 3 }
   0xd   : > { %339 = vmatpush.bf16.msra.mxu0 %v540_v0  ;;  %v537_v3 = vld [vmem:[%s676_s1 + $0x20] sm:$0xff]  ;;  %v536_v4 = vld [vmem:[%s676_s1 + $0x18] sm:$0xff]  ;;  %v535_v5 = vld [vmem:[%s676_s1 + $0x10] sm:$0xff]  ;;  %s491_s4 = sshll.u32 %s684_s24, 2 }
   0xe   : > { %v534_v6 = vld [vmem:[%s676_s1 + $0x8] sm:$0xff]  ;;  %v533_v7 = vld [vmem:[%s676_s1] sm:$0xff]  ;;  %s236_s9 = scalar_lea.vmem %s675_s0, %s491_s4  ;;  %s257_s17 = scalar_lea.vmem %s678_s3, %s491_s4 }
   0xf   : > { %v532_v8 = vld [vmem:[%s236_s9] sm:$0xff] }
  0x10   : > { %v570_v10 = vld [vmem:[%s677_s2] ss:$0 sm:$0xff] }
  0x11   : > { %340 = vmatpush.bf16.msra.mxu0 %v539_v1 }
  0x15   : > { %341 = vmatpush.bf16.msra.mxu0 %v538_v2 }
  0x19   : > { %342 = vmatpush.bf16.msra.mxu0 %v537_v3 }
  0x1d   : > { %343 = vmatpush.bf16.msra.mxu0 %v536_v4 }
  0x21   : > { %344 = vmatpush.bf16.msra.mxu0 %v535_v5 }
  0x25   : > { %345 = vmatpush.bf16.msra.mxu0 %v534_v6 }
  0x29   : > { %346 = vmatpush.bf16.msra.mxu0 %v533_v7 }
  0x2c   : > { %347 = vmatmul.bf16.vlgmr.msra.gmra.mxu0 %v532_v8 }
  0xa9   : > { %v348_v9 = vpop.f32.mrf.mxu0 }
  0xaa   : > { %v366_v12 = vadd.f32 %v570_v10, %v348_v9 }
  0xb1   : > { %v350_v11 = vpop.f32.mrf.mxu0 }
  0xb2   : > { %v367_v13 = vadd.f32 %v570_v10, %v350_v11 }
  0xb4   : > { %v544_v14 = vpack.c.bf16 %v367_v13, %v366_v12 }
  0xb6   : > { %545 = vst [vmem:[%s257_s17] sm:$0xff] %v544_v14  }
  0xb7 PF: > { %s13_s14 = sadd.s32 1, %s593_s14   ;;  %s679_s12 = smov %s589_s13 }
  0xb8   : > { %p10_p5 = scmp.ge.s32.totalorder %s13_s14, 4   ;;  %s680_s13 = smov %s682_s15 }
  0xba   :  { %12 = sbr.rel (!%p10_p5) target bundleno = 2 (0x2), region = 76 }

// kernel: roformer_backbone.14
= control target key start
LH: loop header
LB: loop body
LE: loop exit
PB: predicated region body
PF: predicated region fallthrough
CT: control target
= control target key end

     0   :  { %s750_s21 = smov 0   ;;  %s752_s22 = smov 0   ;;  %s824_s0 = inlined_call_operand.vmem [shape: bf16[32,128], index: 0, kind: input, shape index: {}]   ;;  %s825_s1 = inlined_call_operand.vmem [shape: bf16[128,128], index: 1, kind: input, shape index: {}]   ;;  %s826_s2 = inlined_call_operand.vmem [shape: f32[1,128], index: 2, kind: input, shape index: {}]   ;;  %s827_s3 = inlined_call_operand.vmem [shape: bf16[32,128], index: 3, kind: input, shape index: {}]   ;;  %s828_s4 = inlined_call_operand.vmem [shape: f32[1,128], index: 4, kind: input, shape index: {}]   ;;  %s829_s5 = inlined_call_operand.vmem [shape: f32[1,128], index: 5, kind: input, shape index: {}]   ;;  %s830_s6 = inlined_call_operand.vmem [shape: bf16[32,128], index: 6, kind: output, shape index: {}]  }
   0x1   :  { %s754_s23 = smov 0  }
   0x2 LB: > { %s28_s24 = sadd.s32 1, %s709_s22  ;;  %p597_p0 = scmp.ge.s32.totalorder %s713_s23, 1  ;;  %s713_s23 = sphi %s754_s23, %s16_s23   ;;  %s709_s22 = sphi %s752_s22, %s832_s22   ;;  %s705_s21 = sphi %s750_s21, %s831_s21  }
   0x3   : > { %p30_p1 = scmp.ge.s32.totalorder %s28_s24, 2  ;;  %p252_p2 = scmp.lt.s32.totalorder %s713_s23, 3 }
   0x5   : > { %s834_s24 = smov (%p30_p1, %s28_s24), 0  ;;  %p253_p3 = pnand %p597_p0, %p252_p2 }
   0x6   : > { %s598_s9 = sshll.u32 (!%p253_p3), %s705_s21, 1 }
   0x7   : > { %256 = sbr.rel (%p253_p3) target bundleno = 333 (0x14d), region = 44  ;;  %p296_p4 = scmp.lt.s32.totalorder (!%p253_p3), %s598_s9, 3 }
   0xc   : > { %v650_v0 = vld [vmem:[%s825_s1 + $0x38] sm:$0xff]  ;;  %v649_v1 = vld [vmem:[%s825_s1 + $0x30] sm:$0xff]  ;;  %v648_v2 = vld [vmem:[%s825_s1 + $0x28] sm:$0xff]  ;;  %s836_s9 = smov (!%p296_p4, %s598_s9), 3 }
   0xd   : > { %402 = vmatpush.bf16.msra.mxu0 %v650_v0  ;;  %v647_v3 = vld [vmem:[%s825_s1 + $0x20] sm:$0xff]  ;;  %v646_v4 = vld [vmem:[%s825_s1 + $0x18] sm:$0xff]  ;;  %v645_v5 = vld [vmem:[%s825_s1 + $0x10] sm:$0xff]  ;;  %s789_s16 = sshll.u32 %s836_s9, 2 }
   0xe   : > { %v644_v6 = vld [vmem:[%s825_s1 + $0x8] sm:$0xff]  ;;  %v643_v7 = vld [vmem:[%s825_s1] sm:$0xff]  ;;  %s302_s21 = scalar_lea.vmem %s824_s0, %s789_s16  ;;  %s314_s27 = scalar_lea.vmem %s827_s3, %s789_s16 }
   0xf   : > { %v642_v8 = vld [vmem:[%s302_s21] sm:$0xff]  ;;  %s320_s12 = scalar_lea.vmem %s830_s6, %s789_s16 }
  0x10   : > { %v652_v9 = vld [vmem:[%s314_s27] sm:$0xff]  }
  0x11   : > { %403 = vmatpush.bf16.msra.mxu0 %v649_v1  ;;  %v684_v10 = vld [vmem:[%s826_s2] ss:$0 sm:$0xff]  ;;  %v653_v11 = vunpack.c.l.bf16 %v652_v9  ;;  %v654_v16 = vunpack.c.h.bf16 %v652_v9 }
  0x12   : > { %v685_v48 = vld [vmem:[%s828_s4] ss:$0 sm:$0xff] }
  0x13   : > { %v686_v53 = vld [vmem:[%s829_s5] ss:$0 sm:$0xff] }
  0x15   : > { %404 = vmatpush.bf16.msra.mxu0 %v648_v2 }
  0x19   : > { %405 = vmatpush.bf16.msra.mxu0 %v647_v3 }
  0x1d   : > { %406 = vmatpush.bf16.msra.mxu0 %v646_v4 }
  0x21   : > { %407 = vmatpush.bf16.msra.mxu0 %v645_v5 }
  0x25   : > { %408 = vmatpush.bf16.msra.mxu0 %v644_v6 }
  0x29   : > { %409 = vmatpush.bf16.msra.mxu0 %v643_v7 }
  0x2c   : > { %410 = vmatmul.bf16.vlgmr.msra.gmra.mxu0 %v642_v8 }
  0xa9   : > { %v411_v12 = vpop.f32.mrf.mxu0 }
  0xaa   : > { %v429_v13 = vadd.f32 %v684_v10, %v411_v12 }
  0xac   : > { %v435_v14 = vadd.f32 %v653_v11, %v429_v13 }
  0xae   : > { %437 = vadd.xlane.f32.xlu0 %v435_v14  ;;  %v443_v15 = vmul.f32 %v435_v14, %v435_v14 }
  0xb0   : > { %445 = vadd.xlane.f32.xlu1 %v443_v15 }
  0xb1   : > { %v413_v17 = vpop.f32.mrf.mxu0 }
  0xb2   : > { %v430_v18 = vadd.f32 %v684_v10, %v413_v17 }
  0xb4   : > { %v436_v19 = vadd.f32 %v654_v16, %v430_v18 }
  0xb6   : > { %439 = vadd.xlane.f32.xlu0 %v436_v19  ;;  %v444_v20 = vmul.f32 %v436_v19, %v436_v19 }
  0xb8   : > { %447 = vadd.xlane.f32.xlu1 %v444_v20 }
 0x121   : > { %v438_v21 = vpop.xlane.xlu0 %437 }
 0x122   : > { %v441_v22 = vmul.f32 0.03125, %v438_v21 }
 0x123   : > { %v446_v23 = vpop.xlane.xlu1 %445 }
 0x124   : > { %v451_v24 = vmul.f32 %v441_v22, %v441_v22  ;;  %v449_v25 = vmul.f32 0.03125, %v446_v23  ;;  %v455_v46 = vsub.f32 %v435_v14, %v441_v22 }
 0x126   : > { %v453_v26 = vsub.f32 %v449_v25, %v451_v24 }
 0x128   : > { %v457_v27 = vadd.f32 1e-12, %v453_v26 }
 0x129   : > { %v440_v28 = vpop.xlane.xlu0 %439 }
 0x12a   : > { %687 = vrsqrt.f32 %v457_v27  ;;  %v442_v29 = vmul.f32 0.03125, %v440_v28  ;;  %vm465_vm1 = vweird.f32 %v457_v27 }
 0x12b   : > { %v448_v30 = vpop.xlane.xlu1 %447 }
 0x12c   : > { %v452_v31 = vmul.f32 %v442_v29, %v442_v29  ;;  %v450_v32 = vmul.f32 0.03125, %v448_v30  ;;  %v456_v51 = vsub.f32 %v436_v19, %v442_v29 }
 0x12e   : > { %v454_v33 = vsub.f32 %v450_v32, %v452_v31 }
 0x130   : > { %v688_v34 = vpop.eup %687  ;;  %v458_v35 = vadd.f32 1e-12, %v454_v33 }
 0x131   : > { %v460_v36 = vmul.f32 %v688_v34, %v457_v27  ;;  %vm466_vm0 = vweird.f32 %v688_v34 }
 0x132   : > { %689 = vrsqrt.f32 %v458_v35  ;;  %vm467_vm2 = vmor %vm465_vm1, %vm466_vm0  ;;  %vm475_vm4 = vweird.f32 %v458_v35 }
 0x133   : > { %v461_v37 = vmul.f32 %v688_v34, %v460_v36 }
 0x135   : > { %v462_v38 = vmul.f32 0.5, %v461_v37 }
 0x137   : > { %v463_v39 = vsub.f32 1.5, %v462_v38 }
 0x138   : > { %v690_v40 = vpop.eup %689 }
 0x139   : > { %v464_v41 = vmul.f32 %v688_v34, %v463_v39  ;;  %v470_v42 = vmul.f32 %v690_v40, %v458_v35  ;;  %vm476_vm3 = vweird.f32 %v690_v40 }
 0x13a   : > { %vm477_vm5 = vmor %vm475_vm4, %vm476_vm3 }
 0x13b   : > { %v471_v43 = vmul.f32 %v690_v40, %v470_v42  ;;  %v468_v44 = vsel %vm467_vm2, %v688_v34, %v464_v41 }
 0x13c   : > { %v479_v49 = vmul.f32 %v468_v44, %v455_v46 }
 0x13d   : > { %v472_v45 = vmul.f32 0.5, %v471_v43 }
 0x13e   : > { %v485_v54 = vmul.f32 %v685_v48, %v479_v49 }
 0x13f   : > { %v473_v47 = vsub.f32 1.5, %v472_v45 }
 0x140   : > { %v491_v57 = vadd.f32 %v686_v53, %v485_v54 }
 0x141   : > { %v474_v50 = vmul.f32 %v690_v40, %v473_v47 }
 0x143   : > { %v478_v52 = vsel %vm477_vm5, %v690_v40, %v474_v50 }
 0x144   : > { %v480_v55 = vmul.f32 %v478_v52, %v456_v51 }
 0x146   : > { %v486_v56 = vmul.f32 %v685_v48, %v480_v55 }
 0x148   : > { %v492_v58 = vadd.f32 %v686_v53, %v486_v56 }
 0x14a   : > { %v658_v59 = vpack.c.bf16 %v492_v58, %v491_v57 }
 0x14c   : > { %659 = vst [vmem:[%s320_s12] sm:$0xff] %v658_v59  }
 0x14d PF: > { %s16_s23 = sadd.s32 1, %s713_s23   ;;  %s831_s21 = smov %s709_s22 }
 0x14e   : > { %p13_p5 = scmp.ge.s32.totalorder %s16_s23, 4   ;;  %s832_s22 = smov %s834_s24 }
 0x150   :  { %15 = sbr.rel (!%p13_p5) target bundleno = 2 (0x2), region = 88 }

// kernel: roformer_backbone.13
= control target key start
LH: loop header
LB: loop body
LE: loop exit
PB: predicated region body
PF: predicated region fallthrough
CT: control target
= control target key end

     0   :  { %s1310_s18 = smov [#allocation6]   ;;  %s1603_s0 = inlined_call_operand.vmem [shape: s32[2], index: 0, kind: input, shape index: {}]   ;;  %s1604_s1 = inlined_call_operand.vmem [shape: bf16[2,4,16,8], index: 1, kind: input, shape index: {}]   ;;  %s1605_s2 = inlined_call_operand.vmem [shape: bf16[2,4,16,8], index: 2, kind: input, shape index: {}]   ;;  %s1606_s3 = inlined_call_operand.vmem [shape: bf16[2,4,16,8], index: 3, kind: input, shape index: {}]   ;;  %s1607_s4 = inlined_call_operand.vmem [shape: bf16[2,4,16,8], index: 4, kind: output, shape index: {}]  }
   0x1   :  { %s10_s17 = sshll.u32 %s1603_s0, 4  ;;  %s11_s17 = int_to_ptr.vmem [resolvable:$true] %s10_s17 }
   0x2   :  { %13 = dma.vmem_to_smem %s11_s17, 16, %s1310_s18, [#allocation5] }
   0x3   :  { %1296 = dma.done.wait [#allocation5], 16 }
   0x4   :  { %1297 = vsyncadd [#allocation5], 4294967280 }
   0x5   :  { %16 = sfence }
   0x6   :  { %s1343_s19 = smov 0   ;;  %s1345_s20 = smov 0  }
   0x7   :  { %s1347_s21 = smov 0  }
   0x8 LB: > { %s41_s0 = sadd.s32 1, %s1304_s20  ;;  %p1104_p0 = scmp.ge.s32.totalorder %s1308_s21, 1  ;;  %s1308_s21 = sphi %s1347_s21, %s22_s21   ;;  %s1304_s20 = sphi %s1345_s20, %s1611_s20   ;;  %s1300_s19 = sphi %s1343_s19, %s1610_s19  }
   0x9   : > { %p43_p1 = scmp.ge.s32.totalorder %s41_s0, 2  ;;  %p208_p2 = scmp.lt.s32.totalorder %s1308_s21, 3 }
   0xb   : > { %s1613_s0 = smov (%p43_p1, %s41_s0), 0  ;;  %p209_p3 = pnand %p1104_p0, %p208_p2 }
   0xc   : > { %p259_p4 = scmp.lt.s32.totalorder (!%p209_p3), %s1300_s19, 1  ;;  %s1361_s22 = sld [smem:[#allocation6 + %s1300_s19]] (!%p209_p3) }
   0xd   : > { %212 = sbr.rel (%p209_p3) target bundleno = 735 (0x2df), region = 32 }
  0x12   : > { %vm304_vm0 = vcmask 7168   ;;  %v1311_v0 = vmov -1e+30   ;;  %s1615_s19 = smov (!%p259_p4, %s1300_s19), 1  ;;  %v1312_v1 = vmov 0.0   ;;  %vm321_vm1 = vcmask 64512  }
  0x13   : > { %305 = vst.msk [vmem:[#allocation2] sm:$0xff] %vm304_vm0, %v1311_v0  ;;  %s1173_s23 = sshll.u32 %s1615_s19, 5  ;;  %p1114_p5 = scmp.le.s32.totalorder %s1361_s22, 0 }
  0x14   : > { %306 = vst.msk [vmem:[#allocation2 + $0x8] sm:$0xff] %vm304_vm0, %v1311_v0  ;;  %s1370_s26 = scalar_lea.vmem %s1604_s1, %s1173_s23  ;;  %s276_s29 = scalar_lea.vmem %s1605_s2, %s1173_s23 }
  0x15   : > { %307 = vst.msk [vmem:[#allocation2 + $0x10] sm:$0xff] %vm304_vm0, %v1311_v0  ;;  %s1379_s6 = scalar_lea.vmem %s1606_s3, %s1173_s23  ;;  %s1384_s9 = scalar_lea.vmem %s1607_s4, %s1173_s23 }
  0x16   : > { %308 = vst.msk [vmem:[#allocation2 + $0x18] sm:$0xff] %vm304_vm0, %v1311_v0 }
  0x17   : > { %309 = vst.msk [vmem:[#allocation2 + $0x20] sm:$0xff] %vm304_vm0, %v1311_v0 }
  0x18   : > { %310 = vst.msk [vmem:[#allocation2 + $0x28] sm:$0xff] %vm304_vm0, %v1311_v0 }
  0x19   : > { %311 = vst.msk [vmem:[#allocation2 + $0x30] sm:$0xff] %vm304_vm0, %v1311_v0 }
  0x1a   : > { %312 = vst.msk [vmem:[#allocation2 + $0x38] sm:$0xff] %vm304_vm0, %v1311_v0 }
  0x1b   : > { %313 = vst.msk [vmem:[#allocation3] sm:$0xff] %vm304_vm0, %v1312_v1 }
  0x1c   : > { %314 = vst.msk [vmem:[#allocation3 + $0x8] sm:$0xff] %vm304_vm0, %v1312_v1 }
  0x1d   : > { %315 = vst.msk [vmem:[#allocation3 + $0x10] sm:$0xff] %vm304_vm0, %v1312_v1 }
  0x1e   : > { %316 = vst.msk [vmem:[#allocation3 + $0x18] sm:$0xff] %vm304_vm0, %v1312_v1 }
  0x1f   : > { %317 = vst.msk [vmem:[#allocation3 + $0x20] sm:$0xff] %vm304_vm0, %v1312_v1 }
  0x20   : > { %318 = vst.msk [vmem:[#allocation3 + $0x28] sm:$0xff] %vm304_vm0, %v1312_v1 }
  0x21   : > { %319 = vst.msk [vmem:[#allocation3 + $0x30] sm:$0xff] %vm304_vm0, %v1312_v1 }
  0x22   : > { %320 = vst.msk [vmem:[#allocation3 + $0x38] sm:$0xff] %vm304_vm0, %v1312_v1 }
  0x23   : > { %322 = vst.msk [vmem:[#allocation4] sm:$0xff] %vm321_vm1, %v1312_v1 }
  0x24   : > { %323 = vst.msk [vmem:[#allocation4 + $0x8] sm:$0xff] %vm321_vm1, %v1312_v1 }
  0x25   : > { %324 = vst.msk [vmem:[#allocation4 + $0x10] sm:$0xff] %vm321_vm1, %v1312_v1 }
  0x26   : > { %325 = vst.msk [vmem:[#allocation4 + $0x18] sm:$0xff] %vm321_vm1, %v1312_v1  ;;  %334 = sbr.rel (%p1114_p5) target bundleno = 590 (0x24e), region = 40 }
  0x27   : > { %326 = vst.msk [vmem:[#allocation4 + $0x20] sm:$0xff] %vm321_vm1, %v1312_v1 }
  0x28   : > { %327 = vst.msk [vmem:[#allocation4 + $0x28] sm:$0xff] %vm321_vm1, %v1312_v1 }
  0x29   : > { %328 = vst.msk [vmem:[#allocation4 + $0x30] sm:$0xff] %vm321_vm1, %v1312_v1 }
  0x2a   : > { %329 = vst.msk [vmem:[#allocation4 + $0x38] sm:$0xff] %vm321_vm1, %v1312_v1 }
  0x2b   : > { %v1181_v2 = vld [vmem:[%s276_s29] sm:$0xff]  ;;  %v1182_v3 = vld [vmem:[%s276_s29 + $0x8] sm:$0xff]  ;;  %v1183_v4 = vld [vmem:[%s276_s29 + $0x10] sm:$0xff]  ;;  %v480_v14 = vlaneseq  ;;  %v484_v16 = vstv %s1361_s22  ;;  %vm504_vm3 = vcmask 130048   ;;  %v1313_v42 = vmov 0  }
  0x2c   : > { %v1184_v5 = vld [vmem:[%s276_s29 + $0x18] sm:$0xff]  ;;  %v374_v6 = vsel %vm321_vm1, %v1181_v2, 0  ;;  %v404_v7 = vsel %vm321_vm1, %v1182_v3, 0  ;;  %v434_v8 = vsel %vm321_vm1, %v1183_v4, 0  ;;  %v1177_v10 = vld [vmem:[%s1370_s26] sm:$0xff]  ;;  %v1178_v11 = vld [vmem:[%s1370_s26 + $0x8] sm:$0xff]  ;;  %1220 = vset.pattern.permute.xlu1 %v1313_v42  ;;  %1218 = vset.pattern.permute.xlu2 %v1313_v42 }
  0x2d   : > { %383 = vmatpush.bf16.xpose.msra.mxu0 %v374_v6  ;;  %413 = vmatpush.bf16.xpose.msra.mxu1 %v404_v7  ;;  %v464_v9 = vsel %vm321_vm1, %v1184_v5, 0  ;;  %v1179_v12 = vld [vmem:[%s1370_s26 + $0x10] sm:$0xff]  ;;  %v1180_v13 = vld [vmem:[%s1370_s26 + $0x18] sm:$0xff]  ;;  %v481_v15 = vand.u32 127, %v480_v14  ;;  %v496_v44 = vld [vmem:[#allocation2] sm:$0xff] }
  0x2e   : > { %443 = vmatpush.bf16.xpose.msra.mxu2 %v434_v8  ;;  %473 = vmatpush.bf16.xpose.msra.mxu3 %v464_v9  ;;  %v498_v43 = vld [vmem:[#allocation2 + $0x10] sm:$0xff]  ;;  %v500_v50 = vld [vmem:[#allocation2 + $0x20] sm:$0xff]  ;;  %v497_v51 = vld [vmem:[#allocation2 + $0x8] sm:$0xff] }
  0x2f   : > { %vm1419_vm2 = vcmp.lt.s32.totalorder %v481_v15, %v484_v16  ;;  %1219 = vset.pattern.permute.xlu0 %v1313_v42  ;;  %v1473_v49 = vld [vmem:[#allocation2 + $0x30] sm:$0xff]  ;;  %v499_v60 = vld [vmem:[#allocation2 + $0x18] sm:$0xff]  ;;  %v1485_v61 = vld [vmem:[#allocation2 + $0x28] sm:$0xff] }
  0x30   : > { %v1496_v6 = vld [vmem:[#allocation2 + $0x38] sm:$0xff] }
  0x34   : > { %1123 = vmatmul.msk.bf16.vlgmr.msra.gmra.mxu0 %vm321_vm1, %v1177_v10  ;;  %1132 = vmatmul.msk.bf16.vlgmr.msra.gmra.mxu1 %vm321_vm1, %v1178_v11 }
  0x35   : > { %1141 = vmatmul.msk.bf16.vlgmr.msra.gmra.mxu2 %vm321_vm1, %v1179_v12  ;;  %1150 = vmatmul.msk.bf16.vlgmr.msra.gmra.mxu3 %vm321_vm1, %v1180_v13 }
  0xb1   : > { %v385_v18 = vpop.f32.mrf.mxu0  ;;  %v415_v19 = vpop.f32.mrf.mxu1 }
  0xb2   : > { %v1425_v20 = vsel %vm1419_vm2, %v385_v18, -1e+30  ;;  %v1429_v21 = vsel %vm1419_vm2, %v415_v19, -1e+30 }
  0xb3   : > { %v511_v22 = vsel %vm504_vm3, %v1429_v21, -inf  ;;  %v505_v23 = vsel %vm504_vm3, %v1425_v20, -inf }
  0xb4   : > { %512 = vmax.xlane.f32.xlu0 %v511_v22  ;;  %506 = vmax.xlane.f32.xlu2 %v505_v23 }
  0xb8   : > { %v445_v24 = vpop.f32.mrf.mxu2  ;;  %v475_v25 = vpop.f32.mrf.mxu3 }
  0xb9   : > { %v1437_v26 = vsel %vm1419_vm2, %v445_v24, -1e+30  ;;  %v1441_v27 = vsel %vm1419_vm2, %v475_v25, -1e+30  ;;  %v387_v28 = vpop.f32.mrf.mxu0  ;;  %v417_v33 = vpop.f32.mrf.mxu1  ;;  %v1188_v24 = vld [vmem:[%s1379_s6 + $0x18] sm:$0xff] }
  0xba   : > { %v1445_v29 = vsel %vm1419_vm2, %v387_v28, -1e+30  ;;  %v523_v30 = vsel %vm504_vm3, %v1441_v27, -inf  ;;  %v517_v31 = vsel %vm504_vm3, %v1437_v26, -inf  ;;  %v1455_v34 = vsel %vm1419_vm2, %v417_v33, -1e+30  ;;  %803 = vmatpush.bf16.msrb.mxu3 %v1188_v24 }
  0xbb   : > { %524 = vmax.xlane.f32.xlu1 %v523_v30  ;;  %v508_v32 = vsel %vm504_vm3, %v1445_v29, -inf  ;;  %v514_v37 = vsel %vm504_vm3, %v1455_v34, -inf  ;;  %v1187_v33 = vld [vmem:[%s1379_s6 + $0x10] sm:$0xff] }
  0xbc   : > { %518 = vmax.xlane.f32.xlu0 %v517_v31  ;;  %509 = vmax.xlane.f32.xlu2 %v508_v32  ;;  %v1185_v32 = vld [vmem:[%s1379_s6] sm:$0xff] }
  0xbd   : > { %719 = vmatpush.bf16.msrb.mxu0 %v1185_v32  ;;  %775 = vmatpush.bf16.msrb.mxu2 %v1187_v33 }
  0xc0   : > { %v447_v35 = vpop.f32.mrf.mxu2  ;;  %v477_v39 = vpop.f32.mrf.mxu3 }
  0xc1   : > { %v1459_v36 = vsel %vm1419_vm2, %v447_v35, -1e+30  ;;  %v1467_v40 = vsel %vm1419_vm2, %v477_v39, -1e+30 }
  0xc2   : > { %v520_v38 = vsel %vm504_vm3, %v1459_v36, -inf  ;;  %v526_v41 = vsel %vm504_vm3, %v1467_v40, -inf }
  0xc3   : > { %515 = vmax.xlane.f32.xlu1 %v514_v37 }
  0xc4   : > { %521 = vmax.xlane.f32.xlu0 %v520_v38 }
  0xcb   : > { %527 = vmax.xlane.f32.xlu1 %v526_v41 }
 0x127   : > { %v513_v45 = vpop.xlane.xlu0 %512  ;;  %v507_v46 = vpop.xlane.xlu2 %506 }
 0x128   : > { %v531_v47 = vmax.f32 %v498_v43, %v513_v45  ;;  %v529_v48 = vmax.f32 %v496_v44, %v507_v46 }
 0x12a   : > { %684 = vst.msk [vmem:[#allocation2 + $0x10] sm:$0xff] %vm304_vm0, %v531_v47  ;;  %v539_v59 = vsub.f32 %v498_v43, %v531_v47  ;;  %v537_v3 = vsub.f32 %v496_v44, %v529_v48  ;;  %v1186_v43 = vld [vmem:[%s1379_s6 + $0x8] sm:$0xff] }
 0x12b   : > { %682 = vst.msk [vmem:[#allocation2] sm:$0xff] %vm304_vm0, %v529_v48  ;;  %747 = vmatpush.bf16.msrb.mxu1 %v1186_v43 }
 0x12c   : > { %v549_v63 = vmul.f32 1.442695, %v539_v59  ;;  %v545_v7 = vmul.f32 1.442695, %v537_v3 }
 0x12e   : > { %v525_v52 = vpop.xlane.xlu1 %524  ;;  %1221 = vpow2.f32 %v549_v63 }
 0x12f   : > { %v1476_v53 = vmax.f32 %v1473_v49, %v525_v52  ;;  %v519_v54 = vpop.xlane.xlu0 %518  ;;  %v510_v55 = vpop.xlane.xlu2 %509  ;;  %1223 = vpow2.f32 %v545_v7 }
 0x130   : > { %v533_v56 = vmax.f32 %v500_v50, %v519_v54  ;;  %v530_v57 = vmax.f32 %v497_v51, %v510_v55 }
 0x131   : > { %v543_v58 = vsub.f32 %v1473_v49, %v1476_v53  ;;  %688 = vst.msk [vmem:[#allocation2 + $0x30] sm:$0xff] %vm304_vm0, %v1476_v53  ;;  %593 = vperm.xlu1 %1220, %v1476_v53   ;;  %v629_v49 = vld [vmem:[#allocation3 + $0x20] sm:$0xff] }
 0x132   : > { %686 = vst.msk [vmem:[#allocation2 + $0x20] sm:$0xff] %vm304_vm0, %v533_v56  ;;  %583 = vperm.xlu2 %1218, %v533_v56   ;;  %v541_v5 = vsub.f32 %v500_v50, %v533_v56  ;;  %v538_v14 = vsub.f32 %v497_v51, %v530_v57 }
 0x133   : > { %683 = vst.msk [vmem:[#allocation2 + $0x8] sm:$0xff] %vm304_vm0, %v530_v57 }
 0x134   : > { %v553_v9 = vmul.f32 1.442695, %v541_v5  ;;  %v1501_v11 = vpop.eup %1221  ;;  %v547_v16 = vmul.f32 1.442695, %v538_v14 }
 0x135   : > { %v1509_v17 = vpop.eup %1223 }
 0x136   : > { %v516_v62 = vpop.xlane.xlu1 %515  ;;  %1225 = vpow2.f32 %v553_v9 }
 0x137   : > { %v532_v0 = vmax.f32 %v499_v60, %v516_v62  ;;  %v522_v1 = vpop.xlane.xlu0 %521 }
 0x138   : > { %v1488_v2 = vmax.f32 %v1485_v61, %v522_v1 }
 0x139   : > { %685 = vst.msk [vmem:[#allocation2 + $0x18] sm:$0xff] %vm304_vm0, %v532_v0  ;;  %568 = vperm.xlu1 %1220, %v530_v57   ;;  %v540_v13 = vsub.f32 %v499_v60, %v532_v0 }
 0x13a   : > { %v542_v4 = vsub.f32 %v1485_v61, %v1488_v2  ;;  %687 = vst.msk [vmem:[#allocation2 + $0x28] sm:$0xff] %vm304_vm0, %v1488_v2  ;;  %588 = vperm.xlu0 %1219, %v1488_v2   ;;  %563 = vperm.xlu2 %1218, %v529_v48  }
 0x13b   : > { %v551_v15 = vmul.f32 1.442695, %v540_v13 }
 0x13c   : > { %v1511_v18 = vpop.eup %1225 }
 0x13d   : > { %1227 = vpow2.f32 %v551_v15 }
 0x13e   : > { %v528_v8 = vpop.xlane.xlu1 %527  ;;  %1229 = vpow2.f32 %v547_v16 }
 0x13f   : > { %v1499_v10 = vmax.f32 %v1496_v6, %v528_v8 }
 0x141   : > { %v544_v12 = vsub.f32 %v1496_v6, %v1499_v10  ;;  %689 = vst.msk [vmem:[#allocation2 + $0x38] sm:$0xff] %vm304_vm0, %v1499_v10  ;;  %578 = vperm.xlu1 %1220, %v532_v0  }
 0x142   : > { %830 = vperm.xlu0 %1219, %v1501_v11   ;;  %598 = vperm.xlu2 %1218, %v1499_v10   ;;  %v557_v10 = vmul.f32 1.442695, %v543_v58  ;;  %v637_v58 = vmul.f32 %v1511_v18, %v629_v49 }
 0x143   : > { %v1515_v19 = vpop.eup %1227 }
 0x144   : > { %v1517_v22 = vpop.eup %1229 }
 0x149   : > { %820 = vperm.xlu1 %1220, %v1509_v17  }
 0x14a   : > { %840 = vperm.xlu0 %1219, %v1511_v18   ;;  %573 = vperm.xlu2 %1218, %v531_v47   ;;  %v626_v18 = vld [vmem:[#allocation3 + $0x8] sm:$0xff] }
 0x151   : > { %835 = vperm.xlu1 %1220, %v1515_v19  }
 0x152   : > { %825 = vperm.xlu2 %1218, %v1517_v22  }
 0x18c   : > { %v584_v23 = vpop.permute.xlu2 %583 }
 0x18d   : > { %v605_v30 = vsub.f32 %v1437_v26, %v584_v23 }
 0x18f   : > { %v617_v35 = vmul.f32 1.442695, %v605_v30 }
 0x194   : > { %v564_v25 = vpop.permute.xlu2 %563 }
 0x195   : > { %v601_v28 = vsub.f32 %v1425_v20, %v564_v25 }
 0x197   : > { %v609_v31 = vmul.f32 1.442695, %v601_v28 }
 0x199   : > { %1231 = vpow2.f32 %v609_v31 }
 0x19a   : > { %1233 = vpow2.f32 %v617_v35 }
 0x19c   : > { %v599_v37 = vpop.permute.xlu2 %598 }
 0x19d   : > { %v608_v38 = vsub.f32 %v1467_v40, %v599_v37 }
 0x19f   : > { %v1232_v39 = vpop.eup %1231  ;;  %v623_v41 = vmul.f32 1.442695, %v608_v38 }
 0x1a0   : > { %v641_v42 = vsel %vm504_vm3, %v1232_v39, 0.0  ;;  %v1234_v45 = vpop.eup %1233  ;;  %v690_v7 = vpack.c.bf16 %v1232_v39, %v1232_v39 }
 0x1a1   : > { %642 = vadd.xlane.f32.xlu0 %v641_v42  ;;  %1235 = vpow2.f32 %v623_v41  ;;  %v653_v40 = vsel %vm504_vm3, %v1234_v45, 0.0  ;;  %v694_v9 = vpack.c.bf16 %v1234_v45, %v1234_v45 }
 0x1a2   : > { %v700_v25 = vunpack.c.l.b16 %v690_v7 }
 0x1a3   : > { %v594_v20 = vpop.permute.xlu1 %593  ;;  %v756_v30 = vunpack.c.l.b16 %v694_v9 }
 0x1a4   : > { %v607_v26 = vsub.f32 %v1441_v27, %v594_v20  ;;  %v574_v44 = vpop.permute.xlu2 %573 }
 0x1a5   : > { %v603_v46 = vsub.f32 %v1429_v21, %v574_v44 }
 0x1a6   : > { %v621_v47 = vmul.f32 1.442695, %v607_v26 }
 0x1a7   : > { %v613_v48 = vmul.f32 1.442695, %v603_v46  ;;  %v1236_v50 = vpop.eup %1235  ;;  %v625_v46 = vld [vmem:[#allocation3] sm:$0xff] }
 0x1a8   : > { %1237 = vpow2.f32 %v621_v47  ;;  %v697_v55 = vpack.c.bf16 %v1236_v50, %v1236_v50  ;;  %v662_v63 = vsel %vm504_vm3, %v1236_v50, 0.0 }
 0x1a9   : > { %1239 = vpow2.f32 %v613_v48  ;;  %654 = vadd.xlane.f32.xlu0 %v653_v40  ;;  %v633_v48 = vmul.f32 %v1509_v17, %v625_v46 }
 0x1aa   : > { %v785_v1 = vunpack.c.l.b16 %v697_v55 }
 0x1ab   : > { %v569_v51 = vpop.permute.xlu1 %568 }
 0x1ac   : > { %v602_v52 = vsub.f32 %v1445_v29, %v569_v51  ;;  %v589_v54 = vpop.permute.xlu0 %588  ;;  %v826_v53 = vpop.permute.xlu2 %825  ;;  %v631_v51 = vld [vmem:[#allocation3 + $0x30] sm:$0xff] }
 0x1ad   : > { %v606_v56 = vsub.f32 %v1459_v36, %v589_v54  ;;  %v627_v54 = vld [vmem:[#allocation3 + $0x10] sm:$0xff] }
 0x1ae   : > { %v1238_v27 = vpop.eup %1237  ;;  %v611_v57 = vmul.f32 1.442695, %v602_v52  ;;  %v632_v52 = vld [vmem:[#allocation3 + $0x38] sm:$0xff] }
 0x1af   : > { %v1240_v59 = vpop.eup %1239  ;;  %v696_v60 = vpack.c.bf16 %v1238_v27, %v1238_v27  ;;  %v619_v21 = vmul.f32 1.442695, %v606_v56  ;;  %v659_v62 = vsel %vm504_vm3, %v1238_v27, 0.0  ;;  %v635_v27 = vmul.f32 %v1501_v11, %v627_v54 }
 0x1b0   : > { %1241 = vpow2.f32 %v611_v57  ;;  %660 = vadd.xlane.f32.xlu2 %v659_v62  ;;  %v647_v0 = vsel %vm504_vm3, %v1240_v59, 0.0  ;;  %v692_v35 = vpack.c.bf16 %v1240_v59, %v1240_v59 }
 0x1b1   : > { %v784_v3 = vunpack.c.l.b16 %v696_v60  ;;  %1243 = vpow2.f32 %v619_v21  ;;  %663 = vadd.xlane.f32.xlu0 %v662_v63  ;;  %648 = vadd.xlane.f32.xlu1 %v647_v0  ;;  %v630_v63 = vld [vmem:[#allocation3 + $0x28] sm:$0xff]  ;;  %v634_v0 = vmul.f32 %v1517_v22, %v626_v18 }
 0x1b2   : > { %v728_v41 = vunpack.c.l.b16 %v692_v35 }
 0x1b3   : > { %v579_v29 = vpop.permute.xlu1 %578  ;;  %v786_v36 = vpack.c.b16 %v785_v1, %v784_v3 }
 0x1b4   : > { %v604_v5 = vsub.f32 %v1455_v34, %v579_v29  ;;  %v559_v34 = vmul.f32 1.442695, %v544_v12  ;;  %v555_v12 = vmul.f32 1.442695, %v542_v4  ;;  %v831_v44 = vpop.permute.xlu0 %830 }
 0x1b5   : > { %1170 = vmatmul.msk.bf16.vlgmr.msrb.gmra.mxu3 %vm504_vm3, %v786_v36 }
 0x1b6   : > { %v1242_v8 = vpop.eup %1241  ;;  %v615_v13 = vmul.f32 1.442695, %v604_v5  ;;  %v628_v5 = vld [vmem:[#allocation3 + $0x18] sm:$0xff] }
 0x1b7   : > { %v1244_v14 = vpop.eup %1243  ;;  %v691_v15 = vpack.c.bf16 %v1242_v8, %v1242_v8  ;;  %v644_v16 = vsel %vm504_vm3, %v1242_v8, 0.0  ;;  %v636_v7 = vmul.f32 %v1515_v19, %v628_v5 }
 0x1b8   : > { %v695_v23 = vpack.c.bf16 %v1244_v14, %v1244_v14  ;;  %1245 = vpow2.f32 %v615_v13  ;;  %645 = vadd.xlane.f32.xlu2 %v644_v16  ;;  %v656_v24 = vsel %vm504_vm3, %v1244_v14, 0.0  ;;  %v810_v13 = vld [vmem:[#allocation4] sm:$0xff] }
 0x1b9   : > { %v701_v28 = vunpack.c.l.b16 %v691_v15  ;;  %657 = vadd.xlane.f32.xlu1 %v656_v24  ;;  %1247 = vpow2.f32 %v559_v34  ;;  %v812_v34 = vld [vmem:[#allocation4 + $0x10] sm:$0xff] }
 0x1ba   : > { %v757_v31 = vunpack.c.l.b16 %v695_v23  ;;  %1249 = vpow2.f32 %v557_v10  ;;  %v817_v23 = vld [vmem:[#allocation4 + $0x38] sm:$0xff] }
 0x1bb   : > { %v702_v32 = vpack.c.b16 %v701_v28, %v700_v25  ;;  %1251 = vpow2.f32 %v555_v12  ;;  %v821_v47 = vpop.permute.xlu1 %820  ;;  %v814_v25 = vld [vmem:[#allocation4 + $0x20] sm:$0xff]  ;;  %v811_v28 = vld [vmem:[#allocation4 + $0x8] sm:$0xff] }
 0x1bc   : > { %v758_v33 = vpack.c.b16 %v757_v31, %v756_v30  ;;  %v841_v45 = vpop.permute.xlu0 %840  ;;  %v858_v15 = vmul.f32 %v821_v47, %v810_v13  ;;  %v859_v19 = vmul.f32 %v826_v53, %v811_v28  ;;  %v815_v12 = vld [vmem:[#allocation4 + $0x28] sm:$0xff] }
 0x1bd   : > { %1155 = vmatmul.msk.bf16.vlgmr.msrb.gmra.mxu0 %vm504_vm3, %v702_v32  ;;  %v862_v31 = vmul.f32 %v841_v45, %v814_v25  ;;  %v813_v45 = vld [vmem:[#allocation4 + $0x18] sm:$0xff] }
 0x1be   : > { %v1246_v37 = vpop.eup %1245  ;;  %1165 = vmatmul.msk.bf16.vlgmr.msrb.gmra.mxu2 %vm504_vm3, %v758_v33  ;;  %v860_v33 = vmul.f32 %v831_v44, %v812_v34 }
 0x1bf   : > { %v693_v38 = vpack.c.bf16 %v1246_v37, %v1246_v37  ;;  %v650_v39 = vsel %vm504_vm3, %v1246_v37, 0.0  ;;  %v1248_v6 = vpop.eup %1247 }
 0x1c0   : > { %651 = vadd.xlane.f32.xlu2 %v650_v39  ;;  %v1250_v20 = vpop.eup %1249  ;;  %v640_v17 = vmul.f32 %v1248_v6, %v632_v52 }
 0x1c1   : > { %v729_v42 = vunpack.c.l.b16 %v693_v38  ;;  %v1252_v26 = vpop.eup %1251  ;;  %v639_v55 = vmul.f32 %v1250_v20, %v631_v51 }
 0x1c2   : > { %v638_v3 = vmul.f32 %v1252_v26, %v630_v63 }
 0x1c3   : > { %v730_v43 = vpack.c.b16 %v729_v42, %v728_v41  ;;  %v1557_v61 = vpop.permute.xlu1 %835  ;;  %v816_v42 = vld [vmem:[#allocation4 + $0x30] sm:$0xff] }
 0x1c4   : > { %v861_v47 = vmul.f32 %v1557_v61, %v813_v45 }
 0x1c5   : > { %1160 = vmatmul.msk.bf16.vlgmr.msrb.gmra.mxu1 %vm504_vm3, %v730_v43  ;;  %855 = vperm.xlu0 %1219, %v1248_v6  }
 0x1d2   : > { %850 = vperm.xlu1 %1220, %v1250_v20  }
 0x1d8   : > { %845 = vperm.xlu2 %1218, %v1252_v26  }
 0x214   : > { %v643_v40 = vpop.xlane.xlu0 %642 }
 0x215   : > { %v665_v50 = vadd.f32 %v643_v40, %v633_v48 }
 0x217   : > { %674 = vst.msk [vmem:[#allocation3] sm:$0xff] %vm304_vm0, %v665_v50 }
 0x21c   : > { %v655_v2 = vpop.xlane.xlu0 %654 }
 0x21d   : > { %v669_v4 = vadd.f32 %v655_v2, %v637_v58 }
 0x21f   : > { %678 = vst.msk [vmem:[#allocation3 + $0x20] sm:$0xff] %vm304_vm0, %v669_v4 }
 0x223   : > { %v661_v56 = vpop.xlane.xlu2 %660 }
 0x224   : > { %v671_v57 = vadd.f32 %v661_v56, %v639_v55  ;;  %v664_v59 = vpop.xlane.xlu0 %663  ;;  %v649_v60 = vpop.xlane.xlu1 %648 }
 0x225   : > { %v672_v21 = vadd.f32 %v664_v59, %v640_v17  ;;  %v667_v62 = vadd.f32 %v649_v60, %v635_v27 }
 0x226   : > { %680 = vst.msk [vmem:[#allocation3 + $0x30] sm:$0xff] %vm304_vm0, %v671_v57 }
 0x227   : > { %681 = vst.msk [vmem:[#allocation3 + $0x38] sm:$0xff] %vm304_vm0, %v672_v21 }
 0x228   : > { %676 = vst.msk [vmem:[#allocation3 + $0x10] sm:$0xff] %vm304_vm0, %v667_v62 }
 0x22b   : > { %v646_v1 = vpop.xlane.xlu2 %645 }
 0x22c   : > { %v666_v29 = vadd.f32 %v646_v1, %v634_v0  ;;  %v658_v36 = vpop.xlane.xlu1 %657 }
 0x22d   : > { %v670_v11 = vadd.f32 %v658_v36, %v638_v3 }
 0x22e   : > { %675 = vst.msk [vmem:[#allocation3 + $0x8] sm:$0xff] %vm304_vm0, %v666_v29 }
 0x22f   : > { %679 = vst.msk [vmem:[#allocation3 + $0x28] sm:$0xff] %vm304_vm0, %v670_v11 }
 0x233   : > { %v652_v8 = vpop.xlane.xlu2 %651 }
 0x234   : > { %v668_v9 = vadd.f32 %v652_v8, %v636_v7 }
 0x236   : > { %677 = vst.msk [vmem:[#allocation3 + $0x18] sm:$0xff] %vm304_vm0, %v668_v9 }
 0x237   : > { %v856_v24 = vpop.permute.xlu0 %855 }
 0x238   : > { %v805_v14 = vpop.f32.mrf.mxu3  ;;  %v865_v30 = vmul.f32 %v856_v24, %v817_v23 }
 0x23a   : > { %v721_v22 = vpop.f32.mrf.mxu0 }
 0x23b   : > { %v866_v16 = vadd.f32 %v858_v15, %v721_v22  ;;  %v846_v20 = vpop.permute.xlu2 %845 }
 0x23c   : > { %v863_v46 = vmul.f32 %v846_v20, %v815_v12 }
 0x23d   : > { %874 = vst.msk [vmem:[#allocation4] sm:$0xff] %vm321_vm1, %v866_v16 }
 0x240   : > { %v807_v32 = vpop.f32.mrf.mxu3 }
 0x241   : > { %v873_v35 = vadd.f32 %v865_v30, %v807_v32  ;;  %v777_v37 = vpop.f32.mrf.mxu2 }
 0x242   : > { %v723_v38 = vpop.f32.mrf.mxu0  ;;  %v749_v39 = vpop.f32.mrf.mxu1  ;;  %v870_v41 = vadd.f32 %v862_v31, %v777_v37 }
 0x243   : > { %881 = vst.msk [vmem:[#allocation4 + $0x38] sm:$0xff] %vm321_vm1, %v873_v35  ;;  %v867_v43 = vadd.f32 %v859_v19, %v723_v38  ;;  %v868_v6 = vadd.f32 %v860_v33, %v749_v39 }
 0x244   : > { %878 = vst.msk [vmem:[#allocation4 + $0x20] sm:$0xff] %vm321_vm1, %v870_v41  ;;  %v851_v10 = vpop.permute.xlu1 %850 }
 0x245   : > { %875 = vst.msk [vmem:[#allocation4 + $0x8] sm:$0xff] %vm321_vm1, %v867_v43  ;;  %v864_v26 = vmul.f32 %v851_v10, %v816_v42 }
 0x246   : > { %876 = vst.msk [vmem:[#allocation4 + $0x10] sm:$0xff] %vm321_vm1, %v868_v6 }
 0x247   : > { %v872_v44 = vadd.f32 %v864_v26, %v805_v14 }
 0x249   : > { %880 = vst.msk [vmem:[#allocation4 + $0x30] sm:$0xff] %vm321_vm1, %v872_v44  ;;  %v779_v48 = vpop.f32.mrf.mxu2 }
 0x24a   : > { %v751_v40 = vpop.f32.mrf.mxu1  ;;  %v871_v50 = vadd.f32 %v863_v46, %v779_v48 }
 0x24b   : > { %v869_v49 = vadd.f32 %v861_v47, %v751_v40 }
 0x24c   : > { %879 = vst.msk [vmem:[#allocation4 + $0x28] sm:$0xff] %vm321_vm1, %v871_v50 }
 0x24d   : > { %877 = vst.msk [vmem:[#allocation4 + $0x18] sm:$0xff] %vm321_vm1, %v869_v49 }
 0x24e PF: > { %v895_v53 = vld [vmem:[#allocation3 + $0x10] sm:$0xff]  ;;  %v893_v58 = vld [vmem:[#allocation3] sm:$0xff]  ;;  %v1314_v2 = vmov 0   ;;  %v896_v61 = vld [vmem:[#allocation3 + $0x18] sm:$0xff]  ;;  %vm965_vm4 = vcmask 60416  }
 0x24f   : > { %1254 = vset.pattern.permute.xlu1 %v1314_v2  ;;  %1253 = vset.pattern.permute.xlu0 %v1314_v2  ;;  %1256 = vrcp.f32 %v895_v53  ;;  %v897_v4 = vld [vmem:[#allocation3 + $0x20] sm:$0xff]  ;;  %v894_v51 = vld [vmem:[#allocation3 + $0x8] sm:$0xff]  ;;  %v900_v17 = vld [vmem:[#allocation3 + $0x38] sm:$0xff] }
 0x250   : > { %1258 = vrcp.f32 %v893_v58  ;;  %1255 = vset.pattern.permute.xlu2 %v1314_v2  ;;  %v898_v55 = vld [vmem:[#allocation3 + $0x28] sm:$0xff]  ;;  %v899_v57 = vld [vmem:[#allocation3 + $0x30] sm:$0xff]  ;;  %v885_v7 = vld [vmem:[#allocation4] sm:$0xff] }
 0x251   : > { %1260 = vrcp.f32 %v896_v61  ;;  %v889_v18 = vld [vmem:[#allocation4 + $0x20] sm:$0xff]  ;;  %v887_v5 = vld [vmem:[#allocation4 + $0x10] sm:$0xff]  ;;  %v886_v23 = vld [vmem:[#allocation4 + $0x8] sm:$0xff] }
 0x252   : > { %1262 = vrcp.f32 %v897_v4 }
 0x253   : > { %1264 = vrcp.f32 %v894_v51  ;;  %v890_v3 = vld [vmem:[#allocation4 + $0x28] sm:$0xff]  ;;  %v891_v19 = vld [vmem:[#allocation4 + $0x30] sm:$0xff] }
 0x254   : > { %1266 = vrcp.f32 %v898_v55  ;;  %v888_v16 = vld [vmem:[#allocation4 + $0x18] sm:$0xff] }
 0x255   : > { %v1257_v52 = vpop.eup %1256  ;;  %1268 = vrcp.f32 %v900_v17  ;;  %v892_v32 = vld [vmem:[#allocation4 + $0x38] sm:$0xff] }
 0x256   : > { %v1259_v54 = vpop.eup %1258  ;;  %921 = vperm.xlu1 %1254, %v1257_v52   ;;  %1270 = vrcp.f32 %v899_v57 }
 0x257   : > { %911 = vperm.xlu0 %1253, %v1259_v54   ;;  %v1261_v56 = vpop.eup %1260 }
 0x258   : > { %v1263_v27 = vpop.eup %1262 }
 0x259   : > { %v1265_v59 = vpop.eup %1264  ;;  %931 = vperm.xlu2 %1255, %v1263_v27  }
 0x25a   : > { %v1267_v60 = vpop.eup %1266 }
 0x25b   : > { %v1269_v21 = vpop.eup %1268 }
 0x25c   : > { %v1271_v62 = vpop.eup %1270 }
 0x25e   : > { %926 = vperm.xlu1 %1254, %v1261_v56  }
 0x25f   : > { %916 = vperm.xlu0 %1253, %v1265_v59  }
 0x261   : > { %936 = vperm.xlu2 %1255, %v1267_v60  }
 0x266   : > { %946 = vperm.xlu1 %1254, %v1269_v21  }
 0x267   : > { %941 = vperm.xlu0 %1253, %v1271_v62  }
 0x2b3   : > { %v932_v63 = vpop.permute.xlu2 %931 }
 0x2b4   : > { %v953_v0 = vmul.f32 %v932_v63, %v889_v18 }
 0x2b6   : > { %v961_v1 = vpack.c.bf16 %v953_v0, %v953_v0 }
 0x2b8   : > { %970 = vst.msk [vmem:[%s1384_s9 + $0x10] sm:$0xf] %vm965_vm4, %v961_v1 }
 0x2bb   : > { %v937_v29 = vpop.permute.xlu2 %936 }
 0x2bc   : > { %v954_v36 = vmul.f32 %v937_v29, %v890_v3 }
 0x2be   : > { %v962_v11 = vpack.c.bf16 %v954_v36, %v954_v36 }
 0x2c0   : > { %971 = vst.msk [vmem:[%s1384_s9 + $0x14] sm:$0xf] %vm965_vm4, %v962_v11 }
 0x2c8   : > { %v922_v8 = vpop.permute.xlu1 %921 }
 0x2c9   : > { %v951_v9 = vmul.f32 %v922_v8, %v887_v5  ;;  %v912_v13 = vpop.permute.xlu0 %911 }
 0x2ca   : > { %v949_v14 = vmul.f32 %v912_v13, %v885_v7 }
 0x2cb   : > { %v959_v15 = vpack.c.bf16 %v951_v9, %v951_v9 }
 0x2cc   : > { %v957_v22 = vpack.c.bf16 %v949_v14, %v949_v14 }
 0x2cd   : > { %968 = vst.msk [vmem:[%s1384_s9 + $0x8] sm:$0xf] %vm965_vm4, %v959_v15 }
 0x2ce   : > { %966 = vst.msk [vmem:[%s1384_s9] sm:$0xf] %vm965_vm4, %v957_v22 }
 0x2d0   : > { %v927_v24 = vpop.permute.xlu1 %926 }
 0x2d1   : > { %v952_v25 = vmul.f32 %v927_v24, %v888_v16  ;;  %v917_v28 = vpop.permute.xlu0 %916 }
 0x2d2   : > { %v950_v34 = vmul.f32 %v917_v28, %v886_v23 }
 0x2d3   : > { %v960_v30 = vpack.c.bf16 %v952_v25, %v952_v25 }
 0x2d4   : > { %v958_v31 = vpack.c.bf16 %v950_v34, %v950_v34 }
 0x2d5   : > { %969 = vst.msk [vmem:[%s1384_s9 + $0xc] sm:$0xf] %vm965_vm4, %v960_v30 }
 0x2d6   : > { %967 = vst.msk [vmem:[%s1384_s9 + $0x4] sm:$0xf] %vm965_vm4, %v958_v31 }
 0x2d8   : > { %v947_v33 = vpop.permute.xlu1 %946 }
 0x2d9   : > { %v956_v35 = vmul.f32 %v947_v33, %v892_v32  ;;  %v942_v37 = vpop.permute.xlu0 %941 }
 0x2da   : > { %v955_v38 = vmul.f32 %v942_v37, %v891_v19 }
 0x2db   : > { %v964_v39 = vpack.c.bf16 %v956_v35, %v956_v35 }
 0x2dc   : > { %v963_v41 = vpack.c.bf16 %v955_v38, %v955_v38 }
 0x2dd   : > { %973 = vst.msk [vmem:[%s1384_s9 + $0x1c] sm:$0xf] %vm965_vm4, %v964_v39 }
 0x2de   : > { %972 = vst.msk [vmem:[%s1384_s9 + $0x18] sm:$0xf] %vm965_vm4, %v963_v41 }
 0x2df PF: > { %s22_s21 = sadd.s32 1, %s1308_s21   ;;  %s1610_s19 = smov %s1304_s20 }
 0x2e0   : > { %p19_p6 = scmp.ge.s32.totalorder %s22_s21, 4   ;;  %s1611_s20 = smov %s1613_s0 }
 0x2e2   :  { %21 = sbr.rel (!%p19_p6) target bundleno = 8 (0x8), region = 80 }

// kernel: roformer_backbone.15
= control target key start
LH: loop header
LB: loop body
LE: loop exit
PB: predicated region body
PF: predicated region fallthrough
CT: control target
= control target key end

     0   :  { %s637_s12 = smov 0   ;;  %s639_s13 = smov 0   ;;  %s704_s0 = inlined_call_operand.vmem [shape: bf16[32,128], index: 0, kind: input, shape index: {}]   ;;  %s705_s1 = inlined_call_operand.vmem [shape: bf16[128,128], index: 1, kind: input, shape index: {}]   ;;  %s706_s2 = inlined_call_operand.vmem [shape: f32[1,128], index: 2, kind: input, shape index: {}]   ;;  %s707_s3 = inlined_call_operand.vmem [shape: bf16[32,128], index: 3, kind: output, shape index: {}]  }
   0x1   :  { %s641_s14 = smov 0  }
   0x2 LB: > { %s32_s15 = sadd.s32 1, %s611_s13  ;;  %p507_p0 = scmp.ge.s32.totalorder %s615_s14, 1  ;;  %s615_s14 = sphi %s641_s14, %s13_s14   ;;  %s611_s13 = sphi %s639_s13, %s709_s13   ;;  %s607_s12 = sphi %s637_s12, %s708_s12  }
   0x3   : > { %p34_p1 = scmp.ge.s32.totalorder %s32_s15, 2  ;;  %p188_p2 = scmp.lt.s32.totalorder %s615_s14, 3 }
   0x5   : > { %s711_s15 = smov (%p34_p1, %s32_s15), 0  ;;  %p189_p3 = pnand %p507_p0, %p188_p2 }
   0x6   : > { %s508_s24 = sshll.u32 (!%p189_p3), %s607_s12, 1 }
   0x7   : > { %192 = sbr.rel (%p189_p3) target bundleno = 204 (0xcc), region = 32  ;;  %p230_p4 = scmp.lt.s32.totalorder (!%p189_p3), %s508_s24, 3 }
   0xc   : > { %v558_v0 = vld [vmem:[%s705_s1 + $0x38] sm:$0xff]  ;;  %v557_v1 = vld [vmem:[%s705_s1 + $0x30] sm:$0xff]  ;;  %v556_v2 = vld [vmem:[%s705_s1 + $0x28] sm:$0xff]  ;;  %s713_s24 = smov (!%p230_p4, %s508_s24), 3 }
   0xd   : > { %339 = vmatpush.bf16.msra.mxu0 %v558_v0  ;;  %v555_v3 = vld [vmem:[%s705_s1 + $0x20] sm:$0xff]  ;;  %v554_v4 = vld [vmem:[%s705_s1 + $0x18] sm:$0xff]  ;;  %v553_v5 = vld [vmem:[%s705_s1 + $0x10] sm:$0xff]  ;;  %s509_s4 = sshll.u32 %s713_s24, 2 }
   0xe   : > { %v552_v6 = vld [vmem:[%s705_s1 + $0x8] sm:$0xff]  ;;  %v551_v7 = vld [vmem:[%s705_s1] sm:$0xff]  ;;  %s236_s9 = scalar_lea.vmem %s704_s0, %s509_s4  ;;  %s257_s17 = scalar_lea.vmem %s707_s3, %s509_s4 }
   0xf   : > { %v550_v8 = vld [vmem:[%s236_s9] sm:$0xff] }
  0x10   : > { %v588_v9 = vld [vmem:[%s706_s2] ss:$0 sm:$0xff] }
  0x11   : > { %340 = vmatpush.bf16.msra.mxu0 %v557_v1 }
  0x15   : > { %341 = vmatpush.bf16.msra.mxu0 %v556_v2 }
  0x19   : > { %342 = vmatpush.bf16.msra.mxu0 %v555_v3 }
  0x1d   : > { %343 = vmatpush.bf16.msra.mxu0 %v554_v4 }
  0x21   : > { %344 = vmatpush.bf16.msra.mxu0 %v553_v5 }
  0x25   : > { %345 = vmatpush.bf16.msra.mxu0 %v552_v6 }
  0x29   : > { %346 = vmatpush.bf16.msra.mxu0 %v551_v7 }
  0x2c   : > { %347 = vmatmul.bf16.vlgmr.msra.gmra.mxu0 %v550_v8 }
  0xa9   : > { %v348_v10 = vpop.f32.mrf.mxu0 }
  0xaa   : > { %v366_v11 = vadd.f32 %v588_v9, %v348_v10 }
  0xac   : > { %v370_v12 = vmul.f32 0.044715, %v366_v11  ;;  %v368_v27 = vmul.f32 0.5, %v366_v11 }
  0xae   : > { %v372_v13 = vmul.f32 %v370_v12, %v366_v11 }
  0xb0   : > { %v374_v14 = vmul.f32 %v372_v13, %v366_v11 }
  0xb1   : > { %v350_v15 = vpop.f32.mrf.mxu0 }
  0xb2   : > { %v376_v16 = vadd.f32 %v374_v14, %v366_v11  ;;  %v367_v17 = vadd.f32 %v588_v9, %v350_v15 }
  0xb4   : > { %v371_v18 = vmul.f32 0.044715, %v367_v17  ;;  %v378_v19 = vmul.f32 0.7978846, %v376_v16  ;;  %v369_v28 = vmul.f32 0.5, %v367_v17 }
  0xb6   : > { %v373_v20 = vmul.f32 %v371_v18, %v367_v17  ;;  %589 = vtanh.f32 %v378_v19 }
  0xb8   : > { %v375_v21 = vmul.f32 %v373_v20, %v367_v17 }
  0xba   : > { %v377_v22 = vadd.f32 %v375_v21, %v367_v17 }
  0xbc   : > { %v379_v23 = vmul.f32 0.7978846, %v377_v22  ;;  %v590_v24 = vpop.eup %589 }
  0xbd   : > { %v382_v25 = vadd.f32 1.0, %v590_v24 }
  0xbe   : > { %591 = vtanh.f32 %v379_v23 }
  0xbf   : > { %v384_v30 = vmul.f32 %v382_v25, %v368_v27 }
  0xc4   : > { %v592_v26 = vpop.eup %591 }
  0xc5   : > { %v383_v29 = vadd.f32 1.0, %v592_v26 }
  0xc7   : > { %v385_v31 = vmul.f32 %v383_v29, %v369_v28 }
  0xc9   : > { %v562_v32 = vpack.c.bf16 %v385_v31, %v384_v30 }
  0xcb   : > { %563 = vst [vmem:[%s257_s17] sm:$0xff] %v562_v32  }
  0xcc PF: > { %s13_s14 = sadd.s32 1, %s615_s14   ;;  %s708_s12 = smov %s611_s13 }
  0xcd   : > { %p10_p5 = scmp.ge.s32.totalorder %s13_s14, 4   ;;  %s709_s13 = smov %s711_s15 }
  0xcf   :  { %12 = sbr.rel (!%p10_p5) target bundleno = 2 (0x2), region = 76 }

</bundles_post_ra>
